<compile_context>
chip_gen: v5e
topology: v5e:2x2
jax: 0.10.0
libtpu: 0.0.40
codegen_flags: <defaults>
</compile_context>

<pallas_src>
import jax
import jax.numpy as jnp
from jax.experimental import pallas as pl
from jax.experimental.pallas import tpu as pltpu


_SQRT_2_OVER_PI = 0.7978845608028654


def _gelu_tanh(x):
    # TODO(synk): torch.nn.GELU() default is the exact erf form; the tanh
    # approximation is used here (guaranteed Mosaic lowering, ~1e-3 max abs err).
    return 0.5 * x * (1.0 + jnp.tanh(_SQRT_2_OVER_PI * (x + 0.044715 * x * x * x)))


def _round_up(x, m):
    return ((x + m - 1) // m) * m


def edge_mlp_kernel(h_sd_ref, h_e_ref,
                    w11sd_ref, w11e_ref, b11_ref,
                    w12_ref, b12_ref, w13_ref,
                    bn_scale_ref, bn_shift_ref, out_ref):
    cd = w12_ref.dtype                       # matmul compute dtype (bf16 or f32)
    h_e = h_e_ref[...]                       # f32; reused for the residual

    # W11(h_EV): one K=2H dot over the packed [src|dst] slab + one K=H dot
    # over h_E (== cat([h_src, h_E, h_dst]) @ W11, just re-ordered).
    x = (jnp.dot(h_sd_ref[...], w11sd_ref[...], preferred_element_type=jnp.float32)
         + jnp.dot(h_e.astype(cd), w11e_ref[...], preferred_element_type=jnp.float32)
         + b11_ref[...])
    x = _gelu_tanh(x)
    x = jnp.dot(x.astype(cd), w12_ref[...],
                preferred_element_type=jnp.float32) + b12_ref[...]
    x = _gelu_tanh(x)
    # b13 is folded into bn_shift in the wrapper.
    msg = jnp.dot(x.astype(cd), w13_ref[...], preferred_element_type=jnp.float32)

    # Residual (dropout is identity in eval mode) + folded eval-mode BatchNorm.
    pre = h_e + msg
    out_ref[...] = (pre * bn_scale_ref[...] + bn_shift_ref[...]).astype(out_ref.dtype)


def edge_mlp(h_V, h_E, edge_idx, params, *, eps=1e-5, tile_e=4096, use_bf16=True,
             out_dtype=jnp.float32, batch_id=None):
    """EdgeMLP forward.

    h_V: [N, H] node features; h_E: [E, H] edge features;
    edge_idx: [2, E] int32 (src, dst); batch_id is unused (as in the module).
    params: 'w11' [3H, H] (rows ordered [src | edge | dst]), 'w12'/'w13' [H, H]
            (already [in, out] matmul layout), 'b11'/'b12'/'b13' [H],
            'bn_gamma'/'bn_beta'/'bn_mean'/'bn_var' [H].
    Returns h_E_out: [E, H] (out_dtype, default float32).
    """
    del batch_id  # unused by the PyTorch forward as well
    N, H = h_V.shape
    E = h_E.shape[0]
    assert h_E.shape[1] == H and params["w11"].shape == (3 * H, H)

    wdt = jnp.bfloat16 if use_bf16 else jnp.float32

    # Row gather done with XLA gather in the wrapper; src and dst rows are
    # packed into one [E, 2H] bf16 slab so the kernel sees a single K=2H dot.
    src_idx = edge_idx[0]
    dst_idx = edge_idx[1]
    h_v = h_V.astype(wdt)
    h_sd = jnp.concatenate(
        [jnp.take(h_v, src_idx, axis=0), jnp.take(h_v, dst_idx, axis=0)], axis=-1)
    h_e = h_E.astype(jnp.float32)

    # Row tiling: multiple of 8, pad E instead of asserting divisibility.
    # Cap the tile so the grid keeps >= 2 steps when E allows it (v7x has two
    # TensorCores; a 1-step grid would idle one of them).
    cap = _round_up(max(1, (E + 1) // 2), 8)
    tile_e = max(8, min(_round_up(int(tile_e), 8), cap))
    E_pad = _round_up(E, tile_e)
    if E_pad != E:
        h_sd = jnp.pad(h_sd, ((0, E_pad - E), (0, 0)))
        h_e = jnp.pad(h_e, ((0, E_pad - E), (0, 0)))

    # Split W11 along its input dim; pack the src/dst blocks into one [2H, H].
    w11 = params["w11"].astype(wdt)
    w11_sd = jnp.concatenate([w11[:H], w11[2 * H:]], axis=0)   # [2H, H]
    w11_e = w11[H:2 * H]                                       # [H, H]
    w12 = params["w12"].astype(wdt)
    w13 = params["w13"].astype(wdt)
    b11 = params["b11"].reshape(1, H).astype(jnp.float32)
    b12 = params["b12"].reshape(1, H).astype(jnp.float32)

    # Fold eval-mode BatchNorm1d into per-channel scale/shift, and fold b13
    # into the shift:  (h_E + X@W13 + b13)*s + t == (h_E + X@W13)*s + (t + s*b13).
    inv_std = 1.0 / jnp.sqrt(params["bn_var"].astype(jnp.float32) + eps)
    bn_scale_v = params["bn_gamma"].astype(jnp.float32) * inv_std
    bn_shift_v = (params["bn_beta"].astype(jnp.float32)
                  - params["bn_mean"].astype(jnp.float32) * bn_scale_v
                  + bn_scale_v * params["b13"].astype(jnp.float32))
    bn_scale = bn_scale_v.reshape(1, H)
    bn_shift = bn_shift_v.reshape(1, H)

    grid = (E_pad // tile_e,)

    def full_spec(shape):
        # Constant index_map -> block is resident across grid steps (no re-DMA).
        return pl.BlockSpec(shape, lambda i: (0, 0))

    inputs = (h_sd, h_e, w11_sd, w11_e, b11, w12, b12, w13, bn_scale, bn_shift)

    in_nbytes = int(sum(int(a.size) * a.dtype.itemsize for a in inputs))
    out_nbytes = E_pad * H * jnp.dtype(out_dtype).itemsize
    cost = pl.CostEstimate(
        flops=2 * E_pad * H * H * 5,        # W11 (3 input blocks) + W12 + W13
        transcendentals=2 * E_pad * H,      # two GELU tanh per element
        bytes_accessed=in_nbytes + out_nbytes,
    )

    out = pl.pallas_call(
        edge_mlp_kernel,
        out_shape=jax.ShapeDtypeStruct((E_pad, H), out_dtype),
        grid_spec=pltpu.PrefetchScalarGridSpec(
            num_scalar_prefetch=0,
            grid=grid,
            in_specs=[
                pl.BlockSpec((tile_e, 2 * H), lambda i: (i, 0)),  # [src|dst] slab
                pl.BlockSpec((tile_e, H), lambda i: (i, 0)),      # h_E tile (f32)
                full_spec((2 * H, H)),   # W11 src|dst block
                full_spec((H, H)),       # W11 edge block
                full_spec((1, H)),       # b11
                full_spec((H, H)),       # W12
                full_spec((1, H)),       # b12
                full_spec((H, H)),       # W13
                full_spec((1, H)),       # BN scale
                full_spec((1, H)),       # BN shift (with b13 folded in)
            ],
            out_specs=pl.BlockSpec((tile_e, H), lambda i: (i, 0)),
        ),
        compiler_params=pltpu.CompilerParams(
            dimension_semantics=("parallel",),
            vmem_limit_bytes=48 * 1024 * 1024,   # v7x-safe; raises v5e/v6e default
        ),
        cost_estimate=cost,
    )(*inputs)

    return out[:E]


def edge_mlp_reference(h_V, h_E, edge_idx, params, *, eps=1e-5, use_bf16=True):
    """Plain-JAX reference mirroring the kernel's numerics (bf16 MXU inputs)."""
    H = h_V.shape[1]
    cd = jnp.bfloat16 if use_bf16 else jnp.float32
    src_idx, dst_idx = edge_idx[0], edge_idx[1]
    hs = h_V[src_idx].astype(cd)
    hd = h_V[dst_idx].astype(cd)
    he = h_E.astype(jnp.float32)
    w11 = params["w11"].astype(cd)
    h_sd = jnp.concatenate([hs, hd], axis=-1)
    w11_sd = jnp.concatenate([w11[:H], w11[2 * H:]], axis=0)
    x = (jnp.dot(h_sd, w11_sd, preferred_element_type=jnp.float32)
         + jnp.dot(he.astype(cd), w11[H:2 * H], preferred_element_type=jnp.float32)
         + params["b11"][None, :])
    x = _gelu_tanh(x)
    x = jnp.dot(x.astype(cd), params["w12"].astype(cd),
                preferred_element_type=jnp.float32) + params["b12"][None, :]
    x = _gelu_tanh(x)
    msg = jnp.dot(x.astype(cd), params["w13"].astype(cd),
                  preferred_element_type=jnp.float32) + params["b13"][None, :]
    pre = he + msg
    inv_std = 1.0 / jnp.sqrt(params["bn_var"] + eps)
    scale = params["bn_gamma"] * inv_std
    shift = params["bn_beta"] - params["bn_mean"] * scale
    return pre * scale[None, :] + shift[None, :]


if __name__ == "__main__":
    # Small shapes consistent with PiFold: H=128 hidden (lane-dense).  E=600
    # exercises row padding and the >=2-grid-step cap (tile_e=304, 2 steps).
    N, H, E = 24, 128, 600

    key = jax.random.PRNGKey(0)
    keys = jax.random.split(key, 14)

    h_V = jax.random.normal(keys[0], (N, H), dtype=jnp.float32)
    h_E = jax.random.normal(keys[1], (E, H), dtype=jnp.float32)
    edge_idx = jnp.stack([
        jax.random.randint(keys[2], (E,), 0, N, dtype=jnp.int32),
        jax.random.randint(keys[3], (E,), 0, N, dtype=jnp.int32),
    ], axis=0)
    batch_id = jnp.zeros((E,), dtype=jnp.int32)   # unused by the forward

    params = {
        "w11": jax.random.normal(keys[4], (3 * H, H), jnp.float32) * 0.05,
        "b11": jax.random.normal(keys[5], (H,), jnp.float32) * 0.1,
        "w12": jax.random.normal(keys[6], (H, H), jnp.float32) * 0.05,
        "b12": jax.random.normal(keys[7], (H,), jnp.float32) * 0.1,
        "w13": jax.random.normal(keys[8], (H, H), jnp.float32) * 0.05,
        "b13": jax.random.normal(keys[9], (H,), jnp.float32) * 0.1,
        "bn_gamma": 1.0 + 0.1 * jax.random.normal(keys[10], (H,), jnp.float32),
        "bn_beta": 0.1 * jax.random.normal(keys[11], (H,), jnp.float32),
        "bn_mean": 0.05 * jax.random.normal(keys[12], (H,), jnp.float32),
        "bn_var": 0.5 + jax.random.uniform(keys[13], (H,), jnp.float32),
    }

    out = edge_mlp(h_V, h_E, edge_idx, params, batch_id=batch_id)
    jax.block_until_ready(out)

    ref = edge_mlp_reference(h_V, h_E, edge_idx, params)
    assert out.shape == (E, H)
    max_err = float(jnp.max(jnp.abs(out - ref)))
    assert jnp.allclose(out, ref, atol=1e-2, rtol=1e-2), max_err

    print("KERNEL_OK")
</pallas_src>

<mosaic_0001>
module attributes {stable_mosaic.version = 11 : i64} {
  func.func @edge_mlp_kernel(%arg0: i32, %arg1: memref<304x256xbf16, #tpu.memory_space<vmem>>, %arg2: memref<304x128xf32, #tpu.memory_space<vmem>>, %arg3: memref<256x128xbf16, #tpu.memory_space<vmem>>, %arg4: memref<128x128xbf16, #tpu.memory_space<vmem>>, %arg5: memref<1x128xf32, #tpu.memory_space<vmem>>, %arg6: memref<128x128xbf16, #tpu.memory_space<vmem>>, %arg7: memref<1x128xf32, #tpu.memory_space<vmem>>, %arg8: memref<128x128xbf16, #tpu.memory_space<vmem>>, %arg9: memref<1x128xf32, #tpu.memory_space<vmem>>, %arg10: memref<1x128xf32, #tpu.memory_space<vmem>>, %arg11: memref<304x128xf32, #tpu.memory_space<vmem>>) attributes {dimension_semantics = [#tpu.dimension_semantics<parallel>], iteration_bounds = array<i64: 2>, scalar_prefetch = 0 : i64, scratch_operands = 0 : i64, tpu.core_type = #tpu.core_type<tc>, window_params = [{transform_indices = @transform_0, window_bounds = array<i64: 304, 256>}, {transform_indices = @transform_1, window_bounds = array<i64: 304, 128>}, {pipeline_mode = #tpu.pipeline_mode<synchronous>, transform_indices = @transform_2, window_bounds = array<i64: 256, 128>}, {pipeline_mode = #tpu.pipeline_mode<synchronous>, transform_indices = @transform_3, window_bounds = array<i64: 128, 128>}, {pipeline_mode = #tpu.pipeline_mode<synchronous>, transform_indices = @transform_4, window_bounds = array<i64: 1, 128>}, {pipeline_mode = #tpu.pipeline_mode<synchronous>, transform_indices = @transform_5, window_bounds = array<i64: 128, 128>}, {pipeline_mode = #tpu.pipeline_mode<synchronous>, transform_indices = @transform_6, window_bounds = array<i64: 1, 128>}, {pipeline_mode = #tpu.pipeline_mode<synchronous>, transform_indices = @transform_7, window_bounds = array<i64: 128, 128>}, {pipeline_mode = #tpu.pipeline_mode<synchronous>, transform_indices = @transform_8, window_bounds = array<i64: 1, 128>}, {pipeline_mode = #tpu.pipeline_mode<synchronous>, transform_indices = @transform_9, window_bounds = array<i64: 1, 128>}, {transform_indices = @transform_10, window_bounds = array<i64: 304, 128>}]} {
    %c0 = arith.constant 0 : index
    %c0_0 = arith.constant 0 : index
    %0 = vector.load %arg2[%c0, %c0_0] : memref<304x128xf32, #tpu.memory_space<vmem>>, vector<304x128xf32>
    %c0_1 = arith.constant 0 : index
    %c0_2 = arith.constant 0 : index
    %1 = vector.load %arg1[%c0_1, %c0_2] : memref<304x256xbf16, #tpu.memory_space<vmem>>, vector<304x256xbf16>
    %c0_3 = arith.constant 0 : index
    %c0_4 = arith.constant 0 : index
    %2 = vector.load %arg3[%c0_3, %c0_4] : memref<256x128xbf16, #tpu.memory_space<vmem>>, vector<256x128xbf16>
    %cst = arith.constant dense<0.000000e+00> : vector<304x128xf32>
    %3 = tpu.matmul %1, %2, %cst {dimension_numbers = #tpu.dot_dimension_numbers<[1], [0], [0], [1], [0, 0, 1, 1], [], []>} : vector<304x256xbf16>, vector<256x128xbf16>, vector<304x128xf32> -> vector<304x128xf32>
    %4 = arith.truncf %0 : vector<304x128xf32> to vector<304x128xbf16>
    %c0_5 = arith.constant 0 : index
    %c0_6 = arith.constant 0 : index
    %5 = vector.load %arg4[%c0_5, %c0_6] : memref<128x128xbf16, #tpu.memory_space<vmem>>, vector<128x128xbf16>
    %cst_7 = arith.constant dense<0.000000e+00> : vector<304x128xf32>
    %6 = tpu.matmul %4, %5, %cst_7 {dimension_numbers = #tpu.dot_dimension_numbers<[1], [0], [0], [1], [0, 0, 1, 1], [], []>} : vector<304x128xbf16>, vector<128x128xbf16>, vector<304x128xf32> -> vector<304x128xf32>
    %7 = arith.addf %3, %6 : vector<304x128xf32>
    %c0_8 = arith.constant 0 : index
    %c0_9 = arith.constant 0 : index
    %8 = vector.load %arg5[%c0_8, %c0_9] : memref<1x128xf32, #tpu.memory_space<vmem>>, vector<1x128xf32>
    %9 = vector.broadcast %8 : vector<1x128xf32> to vector<304x128xf32>
    %10 = arith.addf %7, %9 : vector<304x128xf32>
    %cst_10 = arith.constant 5.000000e-01 : f32
    %11 = vector.broadcast %cst_10 : f32 to vector<304x128xf32>
    %12 = arith.mulf %11, %10 : vector<304x128xf32>
    %cst_11 = arith.constant 4.471500e-02 : f32
    %13 = vector.broadcast %cst_11 : f32 to vector<304x128xf32>
    %14 = arith.mulf %13, %10 : vector<304x128xf32>
    %15 = arith.mulf %14, %10 : vector<304x128xf32>
    %16 = arith.mulf %15, %10 : vector<304x128xf32>
    %17 = arith.addf %10, %16 : vector<304x128xf32>
    %cst_12 = arith.constant 0.797884583 : f32
    %18 = vector.broadcast %cst_12 : f32 to vector<304x128xf32>
    %19 = arith.mulf %18, %17 : vector<304x128xf32>
    %20 = math.tanh %19 : vector<304x128xf32>
    %cst_13 = arith.constant 1.000000e+00 : f32
    %21 = vector.broadcast %cst_13 : f32 to vector<304x128xf32>
    %22 = arith.addf %21, %20 : vector<304x128xf32>
    %23 = arith.mulf %12, %22 : vector<304x128xf32>
    %24 = arith.truncf %23 : vector<304x128xf32> to vector<304x128xbf16>
    %c0_14 = arith.constant 0 : index
    %c0_15 = arith.constant 0 : index
    %25 = vector.load %arg6[%c0_14, %c0_15] : memref<128x128xbf16, #tpu.memory_space<vmem>>, vector<128x128xbf16>
    %cst_16 = arith.constant dense<0.000000e+00> : vector<304x128xf32>
    %26 = tpu.matmul %24, %25, %cst_16 {dimension_numbers = #tpu.dot_dimension_numbers<[1], [0], [0], [1], [0, 0, 1, 1], [], []>} : vector<304x128xbf16>, vector<128x128xbf16>, vector<304x128xf32> -> vector<304x128xf32>
    %c0_17 = arith.constant 0 : index
    %c0_18 = arith.constant 0 : index
    %27 = vector.load %arg7[%c0_17, %c0_18] : memref<1x128xf32, #tpu.memory_space<vmem>>, vector<1x128xf32>
    %28 = vector.broadcast %27 : vector<1x128xf32> to vector<304x128xf32>
    %29 = arith.addf %26, %28 : vector<304x128xf32>
    %cst_19 = arith.constant 5.000000e-01 : f32
    %30 = vector.broadcast %cst_19 : f32 to vector<304x128xf32>
    %31 = arith.mulf %30, %29 : vector<304x128xf32>
    %cst_20 = arith.constant 4.471500e-02 : f32
    %32 = vector.broadcast %cst_20 : f32 to vector<304x128xf32>
    %33 = arith.mulf %32, %29 : vector<304x128xf32>
    %34 = arith.mulf %33, %29 : vector<304x128xf32>
    %35 = arith.mulf %34, %29 : vector<304x128xf32>
    %36 = arith.addf %29, %35 : vector<304x128xf32>
    %cst_21 = arith.constant 0.797884583 : f32
    %37 = vector.broadcast %cst_21 : f32 to vector<304x128xf32>
    %38 = arith.mulf %37, %36 : vector<304x128xf32>
    %39 = math.tanh %38 : vector<304x128xf32>
    %cst_22 = arith.constant 1.000000e+00 : f32
    %40 = vector.broadcast %cst_22 : f32 to vector<304x128xf32>
    %41 = arith.addf %40, %39 : vector<304x128xf32>
    %42 = arith.mulf %31, %41 : vector<304x128xf32>
    %43 = arith.truncf %42 : vector<304x128xf32> to vector<304x128xbf16>
    %c0_23 = arith.constant 0 : index
    %c0_24 = arith.constant 0 : index
    %44 = vector.load %arg8[%c0_23, %c0_24] : memref<128x128xbf16, #tpu.memory_space<vmem>>, vector<128x128xbf16>
    %cst_25 = arith.constant dense<0.000000e+00> : vector<304x128xf32>
    %45 = tpu.matmul %43, %44, %cst_25 {dimension_numbers = #tpu.dot_dimension_numbers<[1], [0], [0], [1], [0, 0, 1, 1], [], []>} : vector<304x128xbf16>, vector<128x128xbf16>, vector<304x128xf32> -> vector<304x128xf32>
    %46 = arith.addf %0, %45 : vector<304x128xf32>
    %c0_26 = arith.constant 0 : index
    %c0_27 = arith.constant 0 : index
    %47 = vector.load %arg9[%c0_26, %c0_27] : memref<1x128xf32, #tpu.memory_space<vmem>>, vector<1x128xf32>
    %48 = vector.broadcast %47 : vector<1x128xf32> to vector<304x128xf32>
    %49 = arith.mulf %46, %48 : vector<304x128xf32>
    %c0_28 = arith.constant 0 : index
    %c0_29 = arith.constant 0 : index
    %50 = vector.load %arg10[%c0_28, %c0_29] : memref<1x128xf32, #tpu.memory_space<vmem>>, vector<1x128xf32>
    %51 = vector.broadcast %50 : vector<1x128xf32> to vector<304x128xf32>
    %52 = arith.addf %49, %51 : vector<304x128xf32>
    %c0_30 = arith.constant 0 : index
    %c0_31 = arith.constant 0 : index
    %53 = vector.load %arg11[%c0_30, %c0_31] : memref<304x128xf32, #tpu.memory_space<vmem>>, vector<304x128xf32>
    tpu.vector_store %arg11[%c0_30, %c0_31], %52 {strides = array<i32>} : memref<304x128xf32, #tpu.memory_space<vmem>>, vector<304x128xf32>,
    return
  }
  func.func @transform_0(%arg0: i32) -> (i32, i32) {
    %c0_i32 = arith.constant 0 : i32
    %c0_i32_0 = arith.constant 0 : i32
    return %arg0, %c0_i32 : i32, i32
  }
  func.func @transform_1(%arg0: i32) -> (i32, i32) {
    %c0_i32 = arith.constant 0 : i32
    %c0_i32_0 = arith.constant 0 : i32
    return %arg0, %c0_i32 : i32, i32
  }
  func.func @transform_2(%arg0: i32) -> (i32, i32) {
    %c0_i32 = arith.constant 0 : i32
    %c0_i32_0 = arith.constant 0 : i32
    %c0_i32_1 = arith.constant 0 : i32
    return %c0_i32, %c0_i32_0 : i32, i32
  }
  func.func @transform_3(%arg0: i32) -> (i32, i32) {
    %c0_i32 = arith.constant 0 : i32
    %c0_i32_0 = arith.constant 0 : i32
    %c0_i32_1 = arith.constant 0 : i32
    return %c0_i32, %c0_i32_0 : i32, i32
  }
  func.func @transform_4(%arg0: i32) -> (i32, i32) {
    %c0_i32 = arith.constant 0 : i32
    %c0_i32_0 = arith.constant 0 : i32
    %c0_i32_1 = arith.constant 0 : i32
    return %c0_i32, %c0_i32_0 : i32, i32
  }
  func.func @transform_5(%arg0: i32) -> (i32, i32) {
    %c0_i32 = arith.constant 0 : i32
    %c0_i32_0 = arith.constant 0 : i32
    %c0_i32_1 = arith.constant 0 : i32
    return %c0_i32, %c0_i32_0 : i32, i32
  }
  func.func @transform_6(%arg0: i32) -> (i32, i32) {
    %c0_i32 = arith.constant 0 : i32
    %c0_i32_0 = arith.constant 0 : i32
    %c0_i32_1 = arith.constant 0 : i32
    return %c0_i32, %c0_i32_0 : i32, i32
  }
  func.func @transform_7(%arg0: i32) -> (i32, i32) {
    %c0_i32 = arith.constant 0 : i32
    %c0_i32_0 = arith.constant 0 : i32
    %c0_i32_1 = arith.constant 0 : i32
    return %c0_i32, %c0_i32_0 : i32, i32
  }
  func.func @transform_8(%arg0: i32) -> (i32, i32) {
    %c0_i32 = arith.constant 0 : i32
    %c0_i32_0 = arith.constant 0 : i32
    %c0_i32_1 = arith.constant 0 : i32
    return %c0_i32, %c0_i32_0 : i32, i32
  }
  func.func @transform_9(%arg0: i32) -> (i32, i32) {
    %c0_i32 = arith.constant 0 : i32
    %c0_i32_0 = arith.constant 0 : i32
    %c0_i32_1 = arith.constant 0 : i32
    return %c0_i32, %c0_i32_0 : i32, i32
  }
  func.func @transform_10(%arg0: i32) -> (i32, i32) {
    %c0_i32 = arith.constant 0 : i32
    %c0_i32_0 = arith.constant 0 : i32
    return %arg0, %c0_i32 : i32, i32
  }
}

</mosaic_0001>

<bundles_post_ra>
// kernel: tpu_custom_call.1
= control target key start
LH: loop header
LB: loop body
LE: loop exit
PB: predicated region body
PF: predicated region fallthrough
CT: control target
= control target key end

     0   :  { %s4725_s0 = inlined_call_operand.hbm [shape: bf16[608,256], index: 0, kind: input, shape index: {}]   ;;  %s4726_s1 = inlined_call_operand.hbm [shape: f32[608,128], index: 1, kind: input, shape index: {}]   ;;  %s4727_s2 = inlined_call_operand.hbm [shape: bf16[256,128], index: 2, kind: input, shape index: {}]   ;;  %s4728_s3 = inlined_call_operand.hbm [shape: bf16[128,128], index: 3, kind: input, shape index: {}]   ;;  %s4729_s4 = inlined_call_operand.vmem [shape: f32[1,128], index: 4, kind: input, shape index: {}]   ;;  %s4730_s5 = inlined_call_operand.hbm [shape: bf16[128,128], index: 5, kind: input, shape index: {}]   ;;  %s4731_s6 = inlined_call_operand.vmem [shape: f32[1,128], index: 6, kind: input, shape index: {}]   ;;  %s4732_s7 = inlined_call_operand.hbm [shape: bf16[128,128], index: 7, kind: input, shape index: {}]   ;;  %s4733_s8 = inlined_call_operand.vmem [shape: f32[1,128], index: 8, kind: input, shape index: {}]   ;;  %s4734_s9 = inlined_call_operand.vmem [shape: f32[1,128], index: 9, kind: input, shape index: {}]   ;;  %s4735_s10 = inlined_call_operand.hbm [shape: f32[608,128], index: 10, kind: output, shape index: {}]  }
   0x1   :  { %4742 = sst [smem:[#allocation25_spill]] %s4727_s2 }
   0x2   :  { %4743 = sst [smem:[#allocation26_spill]] %s4728_s3 }
   0x3   :  { %4744 = sst [smem:[#allocation27_spill]] %s4730_s5 }
   0x4   :  { %4745 = sst [smem:[#allocation28_spill]] %s4732_s7 }
   0x5   :  { %15 = vsyncpa [#allocation3], 0 }
   0x6   :  { %17 = vsyncpa [#allocation3 + $0x1], 0 }
   0x7   :  { %18 = vsyncpa [#allocation6], 0 }
   0x8   :  { %20 = vsyncpa [#allocation6 + $0x1], 0 }
   0x9   :  { %21 = vsyncpa [#allocation9], 0 }
   0xa   :  { %22 = vsyncpa [#allocation12], 0 }
   0xb   :  { %23 = vsyncpa [#allocation4], 0 }
   0xc   :  { %25 = vsyncpa [#allocation4 + $0x1], 0  ;;  %s3758_s13 = smov 0   ;;  %s3760_s14 = smov 0  }
   0xd   :  { %s3762_s15 = smov 0   ;;  %s3764_s16 = smov 0  }
   0xe LB: > { %4746 = sst [smem:[#allocation20_spill]] %s3679_s13  ;;  %s3779_s17 = sadd.s32 4294967295, %s3691_s16   ;;  %s3691_s16 = sphi %s3764_s16, %s4765_s16   ;;  %s3687_s15 = sphi %s3762_s15, %s4767_s15   ;;  %s3683_s14 = sphi %s3760_s14, %s4769_s14   ;;  %s3679_s13 = sphi %s3758_s13, %s4768_s13  }
   0xf   : > { %4747 = sst [smem:[#allocation21_spill]] %s3687_s15  ;;  %s2695_s18 = sadd.s32 4294967294, %s3691_s16  }
  0x10   : > { %p51_p0 = scmp.ne.s32.totalorder %s3683_s14, %s3679_s13  ;;  %p52_p1 = scmp.eq.s32.totalorder %s3779_s17, 0 }
  0x11   : > { %p269_p2 = scmp.eq.s32.totalorder %s3779_s17, 1  ;;  %p275_p3 = scmp.eq.s32.totalorder %s2695_s18, 1 }
  0x12   : > { %p3788_p4 = por %p52_p1, %p51_p0  ;;  %p2696_p5 = scmp.ge.s32.totalorder %s3691_s16, 1 }
  0x13   : > { %p3793_p6 = por %p275_p3, %p51_p0  ;;  %p282_p7 = scmp.lt.s32.totalorder %s3691_s16, 3 }
  0x14   : > { %s4751_s2 = sld [smem:[#allocation25_spill]]  ;;  %s3693_s25 = smov [#allocation7]  }
  0x15   : > { %s4749_s20 = scalar_select %p3793_p6, 1, 0 }
  0x16   : > { %p3801_p8 = pnand %p2696_p5, %p282_p7  ;;  %s295_s26 = sshll.u32 %s3693_s25, 4  ;;  %s296_s26 = int_to_ptr.vmem [resolvable:$true] %s295_s26 }
  0x17   : > { %4750 = sst [smem:[#allocation22_spill]] %s4749_s20  ;;  %s3694_s11 = smov 64  }
  0x18   : > { %p3157_p9 = pneg %p3801_p8  ;;  %s4754_s3 = sld [smem:[#allocation26_spill]] }
  0x19   : > { %s3695_s12 = smov 4   ;;  %s3696_s18 = smov [#allocation8]  }
  0x1a   : > { %s293_s23 = sshll.u32 %s4751_s2, 4  ;;  %p3809_p10 = pnand %p3157_p9, %p52_p1  ;;  %s294_s23 = int_to_ptr.hbm [resolvable:$true] %s293_s23 }
  0x1b   : > { %s309_s21 = sshll.u32 %s3696_s18, 4  ;;  %s4755_s5 = sld [smem:[#allocation27_spill]]  ;;  %s310_s21 = int_to_ptr.vmem [resolvable:$true] %s309_s21 }
  0x1c   : > { %3160 = dma.hbm_to_vmem [thread:$0]  (!%p3809_p10), %s294_s23, 2048, %s296_s26, [#allocation6], %s3694_s11, %s3694_s11, %s3695_s12  }
  0x1d   : > { %s4756_s7 = sld [smem:[#allocation28_spill]]  ;;  %s3697_s26 = smov [#allocation10]  }
  0x1e   : > { %s307_s30 = sshll.u32 %s4754_s3, 4  ;;  %s326_s18 = sshll.u32 %s3697_s26, 4  ;;  %s308_s30 = int_to_ptr.hbm [resolvable:$true] %s307_s30  ;;  %s327_s18 = int_to_ptr.vmem [resolvable:$true] %s326_s18 }
  0x1f   : > { %3163 = dma.hbm_to_vmem [thread:$0]  (!%p3809_p10), %s308_s30, 1024, %s310_s21, [#allocation9], %s3694_s11, %s3694_s11, %s3695_s12  }
  0x20   : > { %s3698_s22 = smov [#allocation11]   ;;  %s3832_s30 = sadd.s32 1, %s3691_s16  }
  0x21   : > { %s324_s2 = sshll.u32 %s4755_s5, 4  ;;  %s343_s25 = sshll.u32 %s3698_s22, 4  ;;  %s325_s2 = int_to_ptr.hbm [resolvable:$true] %s324_s2  ;;  %s344_s25 = int_to_ptr.vmem [resolvable:$true] %s343_s25 }
  0x22   : > { %3166 = dma.hbm_to_vmem [thread:$0]  (!%p3809_p10), %s325_s2, 1024, %s327_s18, [#allocation9], %s3694_s11, %s3694_s11, %s3695_s12  }
  0x23   : > { %s341_s23 = sshll.u32 %s4756_s7, 4  ;;  %4757 = sst [smem:[#allocation23_spill]] %s3832_s30  ;;  %s342_s23 = int_to_ptr.hbm [resolvable:$true] %s341_s23 }
  0x24   : > { %3169 = dma.hbm_to_vmem [thread:$0]  (!%p3809_p10), %s342_s23, 1024, %s344_s25, [#allocation12], %s3694_s11, %s3694_s11, %s3695_s12  }
  0x25   : > { %s38_s21 = sadd.s32 1, %s3687_s15  ;;  %s35_s28 = ssub.s32 %s3691_s16, %s3832_s30 }
  0x26   : > { %p45_p12 = scmp.ne.s32.totalorder %s3687_s15, %s3683_s14  ;;  %p36_p13 = scmp.eq.s32.totalorder %s35_s28, 0 }
  0x27   : > { %p46_p0 = scmp.eq.s32.totalorder %s3691_s16, 0  ;;  %p3185_p5 = scmp.lt.s32.totalorder %s3691_s16, 2 }
  0x28   : > { %p3842_p3 = por %p269_p2, %p45_p12  ;;  %s363_s27 = sand.u32 1, %s3687_s15  }
  0x29   : > { %s3848_s2 = scalar_select %p36_p13, %s3687_s15, %s38_s21  }
  0x2a   : > { %p47_p7 = por %p46_p0, %p45_p12  ;;  %s3851_s11 = smul.u32 304, %s363_s27 }
  0x2b   : > { %4759 = sst [smem:[#allocation24_spill]] %s3848_s2  ;;  %s4736_s12 = smul.u32 304, %s3691_s16 }
  0x2c   : > { %p3854_p9 = pnand %p3185_p5, %p47_p7  ;;  %s367_s25 = scalar_lea.vmem [#allocation2], %s3851_s11 }
  0x2d   : > { %s373_s22 = scalar_lea.hbm %s4725_s0, %s4736_s12  ;;  %s376_s21 = sshll.u32 %s367_s25, 4  ;;  %s377_s21 = int_to_ptr.vmem [resolvable:$true] %s376_s21 }
  0x2e   : > { %s374_s28 = sshll.u32 %s373_s22, 4  ;;  %s386_s3 = sand.u32 1, %s3691_s16   ;;  %s375_s28 = int_to_ptr.hbm [resolvable:$true] %s374_s28 }
  0x2f   : > { %s364_s5 = scalar_lea.sflag [#allocation3], %s363_s27  ;;  %s3549_s7 = sshra.s32 %s375_s28, 4  ;;  %s3550_s7 = int_to_ptr.hbm [resolvable:$true] %s3549_s7 }
  0x30   : > { %s3551_s2 = scalar_lea.hbm %s3550_s7, 304  ;;  %p3553_p10 = pneg %p3854_p9 }
  0x31   : > { %p3552_p2 = scmp.ne.s32.totalorder %s3550_s7, %s3551_s2  ;;  %s3556_s12 = scalar_lea.hbm %s4725_s0, 608 }
  0x32   : > { %p3557_p0 = scmp.lt.s32.totalorder %s3550_s7, %s4725_s0  ;;  %p3558_p5 = scmp.lt.s32.totalorder %s3556_s12, %s3551_s2 }
  0x33   : > { %p3554_p12 = pnand %p3553_p10, %p3552_p2 }
  0x34   : > { %p3559_p7 = por %p3558_p5, %p3557_p0 }
  0x35   : > { %p3555_p13 = pneg %p3554_p12 }
  0x37   : > { %p3560_p11 = pnand %p3559_p7, %p3555_p13 }
  0x39   : > { %3563 = shalt.err (!%p3560_p11)
}
  0x3a   : > { %s3699_s27 = smov 128   ;;  %s3700_s15 = smov 8  }
  0x3b   : > { %3173 = dma.hbm_to_vmem [thread:$0]  (!%p3854_p9), %s375_s28, 4864, %s377_s21, %s364_s5, %s3699_s27, %s3699_s27, %s3700_s15  }
  0x3c   : > { %s4761_s30 = smul.u32 304, %s3691_s16  ;;  %s390_s13 = scalar_lea.vmem [#allocation5], %s3851_s11 }
  0x3d   : > { %s398_s25 = sshll.u32 %s390_s13, 4  ;;  %s387_s2 = scalar_lea.sflag [#allocation6], %s386_s3  ;;  %s399_s25 = int_to_ptr.vmem [resolvable:$true] %s398_s25 }
  0x3e   : > { %s395_s18 = scalar_lea.hbm %s4726_s1, %s4761_s30  ;;  %s3586_s28 = scalar_lea.hbm %s4726_s1, 608 }
  0x3f   : > { %s396_s7 = sshll.u32 %s395_s18, 4  ;;  %s397_s7 = int_to_ptr.hbm [resolvable:$true] %s396_s7 }
  0x40   : > { %s3579_s12 = sshra.s32 %s397_s7, 4  ;;  %s3580_s12 = int_to_ptr.hbm [resolvable:$true] %s3579_s12 }
  0x41   : > { %s3581_s22 = scalar_lea.hbm %s3580_s12, 304  ;;  %p3587_p13 = scmp.lt.s32.totalorder %s3580_s12, %s4726_s1 }
  0x42   : > { %p3582_p11 = scmp.ne.s32.totalorder %s3580_s12, %s3581_s22  ;;  %p3588_p0 = scmp.lt.s32.totalorder %s3586_s28, %s3581_s22 }
  0x44   : > { %p3584_p2 = pnand %p3582_p11, %p3553_p10  ;;  %p3589_p5 = por %p3588_p0, %p3587_p13 }
  0x46   : > { %p3585_p12 = pneg %p3584_p2 }
  0x48   : > { %p3590_p7 = pnand %p3589_p5, %p3585_p12 }
  0x4a   : > { %3593 = shalt.err (!%p3590_p7)
}
  0x4b   : > { %3176 = dma.hbm_to_vmem [thread:$0]  (!%p3854_p9), %s397_s7, 4864, %s399_s25, %s387_s2, %s3699_s27, %s3699_s27, %s3700_s15  }
  0x4c   : > { %410 = sbr.rel (%p3801_p8) target bundleno = 967 (0x3c7), region = 60  ;;  %s3898_s3 = sand.u32 (!%p3801_p8), 1, %s3683_s14  }
  0x4d   : > { %s3901_s13 = smul.u32 (!%p3801_p8), 304, %s3898_s3  ;;  %s413_s11 = scalar_lea.sflag (!%p3801_p8), [#allocation3], %s3898_s3 }
  0x4f   : > { %s3905_s26 = scalar_lea.vmem (!%p3801_p8), [#allocation2], %s3901_s13 }
  0x51   : > { %3654 = dma.done.wait (%p3788_p4), %s413_s11, 4864  }
  0x52   : > { %3656 = vsyncadd (%p3788_p4), %s413_s11, 4294962432  ;;  %s422_s15 = sand.u32 1, %s3779_s17   ;;  %s3913_s23 = scalar_lea.vmem [#allocation5], %s3901_s13 }
  0x53   : > { %s423_s24 = scalar_lea.sflag [#allocation6], %s422_s15 }
  0x54   : > { %3658 = dma.done.wait (%p3788_p4), %s423_s24, 4864  }
  0x55   : > { %3660 = vsyncadd (%p3788_p4), %s423_s24, 4294962432 }
  0x56   : > { %3662 = dma.done.wait (%p52_p1), [#allocation6], 2048  }
  0x57   : > { %3664 = vsyncadd (%p52_p1), [#allocation6], 4294965248 }
  0x58   : > { %3666 = dma.done.wait (%p52_p1), [#allocation9], 2048  }
  0x59   : > { %3668 = vsyncadd (%p52_p1), [#allocation9], 4294965248 }
  0x5a   : > { %3670 = dma.done.wait (%p52_p1), [#allocation12], 1024  }
  0x5b   : > { %3672 = vsyncadd (%p52_p1), [#allocation12], 4294966272  ;;  %v3089_v0 = vld [vmem:[#allocation8 + $0x38] sm:$0xff]  ;;  %v3088_v1 = vld [vmem:[#allocation8 + $0x30] sm:$0xff]  ;;  %s4519_s30 = scalar_lea.vmem [#allocation13], %s3901_s13  ;;  %s3106_s13 = smul.u32 304, %s3779_s17 }
  0x5c   : > { %3108 = vmatpush.bf16.msra.mxu1 %v3089_v0  ;;  %3109 = vmatpush.bf16.msra.mxu2 %v3089_v0  ;;  %v3087_v2 = vld [vmem:[#allocation8 + $0x28] sm:$0xff]  ;;  %v3086_v3 = vld [vmem:[#allocation8 + $0x20] sm:$0xff]  ;;  %v3085_v4 = vld [vmem:[#allocation8 + $0x18] sm:$0xff]  ;;  %s2558_s24 = sshll.u32 %s4519_s30, 4  ;;  %s2546_s17 = scalar_lea.sflag [#allocation4], %s3898_s3  ;;  %s2559_s24 = int_to_ptr.vmem [resolvable:$true] %s2558_s24 }
  0x5d   : > { %683 = vmatpush.bf16.msra.mxu0 %v3089_v0  ;;  %3110 = vmatpush.bf16.msra.mxu3 %v3089_v0  ;;  %v3084_v5 = vld [vmem:[#allocation8 + $0x10] sm:$0xff]  ;;  %v3083_v6 = vld [vmem:[#allocation8 + $0x8] sm:$0xff]  ;;  %v3082_v7 = vld [vmem:[#allocation8] sm:$0xff]  ;;  %s2557_s15 = scalar_lea.hbm %s4735_s10, %s3106_s13  ;;  %s3629_s7 = scalar_lea.hbm %s4735_s10, 608 }
  0x5e   : > { %v502_v8 = vld [vmem:[%s3913_s23 + $0x50] sm:$0xff]  ;;  %v503_v9 = vld [vmem:[%s3913_s23 + $0x58] sm:$0xff]  ;;  %v512_v10 = vld [vmem:[%s3913_s23 + $0xa0] sm:$0xff]  ;;  %s2560_s19 = sshll.u32 %s2557_s15, 4  ;;  %s2561_s19 = int_to_ptr.hbm [resolvable:$true] %s2560_s19 }
  0x5f   : > { %v513_v11 = vld [vmem:[%s3913_s23 + $0xa8] sm:$0xff]  ;;  %v605_v14 = vpack.c.bf16 %v503_v9, %v502_v8  ;;  %v3080_v16 = vld [vmem:[#allocation7 + $0x70] sm:$0xff]  ;;  %v3078_v20 = vld [vmem:[#allocation7 + $0x60] sm:$0xff]  ;;  %s3623_s27 = sshra.s32 %s2561_s19, 4  ;;  %s3624_s27 = int_to_ptr.hbm [resolvable:$true] %s3623_s27 }
  0x60   : > { %3111 = vmatpush.bf16.msra.mxu1 %v3088_v1  ;;  %3112 = vmatpush.bf16.msra.mxu2 %v3088_v1  ;;  %v3081_v12 = vld [vmem:[#allocation7 + $0x78] sm:$0xff]  ;;  %v610_v15 = vpack.c.bf16 %v513_v11, %v512_v10  ;;  %v3072_v17 = vld [vmem:[#allocation7 + $0x30] sm:$0xff]  ;;  %v3079_v18 = vld [vmem:[#allocation7 + $0x68] sm:$0xff]  ;;  %s3625_s18 = scalar_lea.hbm %s3624_s27, 304  ;;  %p3630_p9 = scmp.lt.s32.totalorder %s3624_s27, %s4735_s10 }
  0x61   : > { %684 = vmatpush.bf16.msra.mxu0 %v3088_v1  ;;  %3113 = vmatpush.bf16.msra.mxu3 %v3088_v1  ;;  %v3073_v13 = vld [vmem:[#allocation7 + $0x38] sm:$0xff]  ;;  %v3071_v19 = vld [vmem:[#allocation7 + $0x28] sm:$0xff]  ;;  %v3070_v21 = vld [vmem:[#allocation7 + $0x20] sm:$0xff]  ;;  %p3626_p1 = scmp.ne.s32.totalorder %s3624_s27, %s3625_s18  ;;  %p3631_p10 = scmp.lt.s32.totalorder %s3629_s7, %s3625_s18 }
  0x62   : > { %v504_v22 = vld [vmem:[%s3913_s23 + $0x60] sm:$0xff]  ;;  %v505_v23 = vld [vmem:[%s3913_s23 + $0x68] sm:$0xff]  ;;  %v514_v24 = vld [vmem:[%s3913_s23 + $0xb0] sm:$0xff] }
  0x63   : > { %v515_v25 = vld [vmem:[%s3913_s23 + $0xb8] sm:$0xff]  ;;  %v606_v28 = vpack.c.bf16 %v505_v23, %v504_v22  ;;  %v3076_v30 = vld [vmem:[#allocation7 + $0x50] sm:$0xff]  ;;  %v517_v36 = vld [vmem:[%s3913_s23 + $0xc8] sm:$0xff]  ;;  %p3627_p4 = pnand %p3626_p1, %p3842_p3  ;;  %p3632_p11 = por %p3631_p10, %p3630_p9 }
  0x64   : > { %3114 = vmatpush.bf16.msra.mxu1 %v3087_v2  ;;  %3115 = vmatpush.bf16.msra.mxu2 %v3087_v2  ;;  %v3077_v26 = vld [vmem:[#allocation7 + $0x58] sm:$0xff]  ;;  %v611_v29 = vpack.c.bf16 %v515_v25, %v514_v24  ;;  %v3068_v31 = vld [vmem:[#allocation7 + $0x10] sm:$0xff]  ;;  %v3075_v32 = vld [vmem:[#allocation7 + $0x48] sm:$0xff] }
  0x65   : > { %685 = vmatpush.bf16.msra.mxu0 %v3087_v2  ;;  %3116 = vmatpush.bf16.msra.mxu3 %v3087_v2  ;;  %v3069_v27 = vld [vmem:[#allocation7 + $0x18] sm:$0xff]  ;;  %v506_v33 = vld [vmem:[%s3913_s23 + $0x70] sm:$0xff]  ;;  %v516_v35 = vld [vmem:[%s3913_s23 + $0xc0] sm:$0xff]  ;;  %p3628_p8 = pneg %p3627_p4 }
  0x66   : > { %v507_v34 = vld [vmem:[%s3913_s23 + $0x78] sm:$0xff]  ;;  %v612_v38 = vpack.c.bf16 %v517_v36, %v516_v35  ;;  %v3074_v40 = vld [vmem:[#allocation7 + $0x40] sm:$0xff]  ;;  %v493_v42 = vld [vmem:[%s3913_s23 + $0x8] sm:$0xff] }
  0x67   : > { %v607_v37 = vpack.c.bf16 %v507_v34, %v506_v33  ;;  %v3067_v39 = vld [vmem:[#allocation7 + $0x8] sm:$0xff]  ;;  %v492_v41 = vld [vmem:[%s3913_s23] sm:$0xff]  ;;  %v518_v47 = vld [vmem:[%s3913_s23 + $0xd0] sm:$0xff]  ;;  %p3633_p2 = pnand %p3632_p11, %p3628_p8 }
  0x68   : > { %3117 = vmatpush.bf16.msra.mxu1 %v3086_v3  ;;  %3118 = vmatpush.bf16.msra.mxu2 %v3086_v3  ;;  %v3066_v43 = vld [vmem:[#allocation7] sm:$0xff]  ;;  %v600_v44 = vpack.c.bf16 %v493_v42, %v492_v41  ;;  %v509_v46 = vld [vmem:[%s3913_s23 + $0x88] sm:$0xff]  ;;  %v519_v48 = vld [vmem:[%s3913_s23 + $0xd8] sm:$0xff] }
  0x69   : > { %686 = vmatpush.bf16.msra.mxu0 %v3086_v3  ;;  %3119 = vmatpush.bf16.msra.mxu3 %v3086_v3  ;;  %v508_v45 = vld [vmem:[%s3913_s23 + $0x80] sm:$0xff]  ;;  %v613_v50 = vpack.c.bf16 %v519_v48, %v518_v47  ;;  %v494_v51 = vld [vmem:[%s3913_s23 + $0x10] sm:$0xff]  ;;  %v495_v52 = vld [vmem:[%s3913_s23 + $0x18] sm:$0xff] }
  0x6a   : > { %v608_v49 = vpack.c.bf16 %v509_v46, %v508_v45  ;;  %v601_v53 = vpack.c.bf16 %v495_v52, %v494_v51  ;;  %v510_v54 = vld [vmem:[%s3913_s23 + $0x90] sm:$0xff]  ;;  %v511_v55 = vld [vmem:[%s3913_s23 + $0x98] sm:$0xff]  ;;  %v520_v56 = vld [vmem:[%s3913_s23 + $0xe0] sm:$0xff] }
  0x6b   : > { %v521_v57 = vld [vmem:[%s3913_s23 + $0xe8] sm:$0xff]  ;;  %v609_v58 = vpack.c.bf16 %v511_v55, %v510_v54  ;;  %v496_v60 = vld [vmem:[%s3913_s23 + $0x20] sm:$0xff]  ;;  %v2752_v8 = vld [vmem:[%s3905_s26 + $0x10] sm:$0xf] }
  0x6c   : > { %3120 = vmatpush.bf16.msra.mxu1 %v3085_v4  ;;  %3121 = vmatpush.bf16.msra.mxu2 %v3085_v4  ;;  %v614_v59 = vpack.c.bf16 %v521_v57, %v520_v56  ;;  %v497_v61 = vld [vmem:[%s3913_s23 + $0x28] sm:$0xff]  ;;  %v2744_v63 = vld [vmem:[%s3905_s26] sm:$0xf]  ;;  %v3028_v1 = vld [vmem:[%s3905_s26 + $0x4] sm:$0xf] }
  0x6d   : > { %687 = vmatpush.bf16.msra.mxu0 %v3085_v4  ;;  %3122 = vmatpush.bf16.msra.mxu3 %v3085_v4  ;;  %v602_v62 = vpack.c.bf16 %v497_v61, %v496_v60  ;;  %v3029_v0 = vld [vmem:[%s3905_s26 + $0x4] sm:$0xf0]  ;;  %v2746_v2 = vld [vmem:[%s3905_s26 + $0x8] sm:$0xf0]  ;;  %v3031_v9 = vld [vmem:[%s3905_s26 + $0x14] sm:$0xf0] }
  0x6e   : > { %v2745_v3 = vor.u32 %v3029_v0, %v2744_v63  ;;  %v2749_v4 = vor.u32 %v3028_v1, %v2746_v2  ;;  %v3030_v10 = vld [vmem:[%s3905_s26 + $0x14] sm:$0xf]  ;;  %v2754_v11 = vld [vmem:[%s3905_s26 + $0x18] sm:$0xf0]  ;;  %v2768_v23 = vld [vmem:[%s3905_s26 + $0x30] sm:$0xf] }
  0x6f   : > { %v3035_v24 = vld [vmem:[%s3905_s26 + $0x34] sm:$0xf0]  ;;  %v3034_v25 = vld [vmem:[%s3905_s26 + $0x34] sm:$0xf]  ;;  %v3037_v33 = vld [vmem:[%s3905_s26 + $0x44] sm:$0xf0] }
  0x70   : > { %3123 = vmatpush.bf16.msra.mxu1 %v3084_v5  ;;  %3124 = vmatpush.bf16.msra.mxu2 %v3084_v5  ;;  %v3036_v34 = vld [vmem:[%s3905_s26 + $0x44] sm:$0xf]  ;;  %v2778_v35 = vld [vmem:[%s3905_s26 + $0x48] sm:$0xf0]  ;;  %v2784_v46 = vld [vmem:[%s3905_s26 + $0x50] sm:$0xf] }
  0x71   : > { %688 = vmatpush.bf16.msra.mxu0 %v3084_v5  ;;  %3125 = vmatpush.bf16.msra.mxu3 %v3084_v5  ;;  %v498_v5 = vld [vmem:[%s3913_s23 + $0x30] sm:$0xff]  ;;  %v3097_v45 = vld [vmem:[#allocation10 + $0x38] sm:$0xff]  ;;  %v3095_v60 = vld [vmem:[#allocation10 + $0x28] sm:$0xff] }
  0x72   : > { %v3039_v47 = vld [vmem:[%s3905_s26 + $0x54] sm:$0xf0]  ;;  %v3038_v48 = vld [vmem:[%s3905_s26 + $0x54] sm:$0xf]  ;;  %v525_v54 = vld [vmem:[%s3913_s23 + $0x108] sm:$0xff] }
  0x73   : > { %v2785_v51 = vor.u32 %v3039_v47, %v2784_v46  ;;  %v3096_v57 = vld [vmem:[#allocation10 + $0x30] sm:$0xff]  ;;  %v2794_v0 = vld [vmem:[%s3905_s26 + $0x68] sm:$0xf0]  ;;  %v4048_v46 = vld [vmem:[%s4729_s4] ss:$0 sm:$0xff] }
  0x74   : > { %3126 = vmatpush.bf16.msra.mxu1 %v3083_v6  ;;  %3127 = vmatpush.bf16.msra.mxu2 %v3083_v6  ;;  %v2792_v61 = vld [vmem:[%s3905_s26 + $0x60] sm:$0xf]  ;;  %v3040_v63 = vld [vmem:[%s3905_s26 + $0x64] sm:$0xf] }
  0x75   : > { %689 = vmatpush.bf16.msra.mxu0 %v3083_v6  ;;  %3128 = vmatpush.bf16.msra.mxu3 %v3083_v6  ;;  %v499_v6 = vld [vmem:[%s3913_s23 + $0x38] sm:$0xff] }
  0x78   : > { %3129 = vmatpush.bf16.msra.mxu1 %v3082_v7  ;;  %3130 = vmatpush.bf16.msra.mxu2 %v3082_v7 }
  0x79   : > { %690 = vmatpush.bf16.msra.mxu0 %v3082_v7  ;;  %3131 = vmatpush.bf16.msra.mxu3 %v3082_v7  ;;  %v603_v7 = vpack.c.bf16 %v499_v6, %v498_v5  ;;  %v527_v5 = vld [vmem:[%s3913_s23 + $0x118] sm:$0xff] }
  0x7b   : > { %716 = vmatmul.bf16.vlgmr.msra.gmra.mxu1 %v605_v14  ;;  %741 = vmatmul.bf16.vlgmr.msra.gmra.mxu2 %v610_v15  ;;  %v2760_v14 = vld [vmem:[%s3905_s26 + $0x20] sm:$0xf]  ;;  %v3033_v15 = vld [vmem:[%s3905_s26 + $0x24] sm:$0xf0] }
  0x7c   : > { %1177 = vmatpush.bf16.msrb.mxu2 %v3081_v12  ;;  %1073 = vmatpush.bf16.msrb.mxu1 %v3073_v13  ;;  %v2753_v12 = vor.u32 %v3031_v9, %v2752_v8  ;;  %v2757_v13 = vor.u32 %v3030_v10, %v2754_v11  ;;  %v3094_v8 = vld [vmem:[#allocation10 + $0x20] sm:$0xff] }
  0x7d   : > { %691 = vmatmul.bf16.vlgmr.msra.gmra.mxu0 %v600_v44  ;;  %1752 = vmatpush.bf16.msrb.mxu3 %v3097_v45  ;;  %v2800_v11 = vld [vmem:[%s3905_s26 + $0x70] sm:$0xf] }
  0x80   : > { %1178 = vmatpush.bf16.msrb.mxu2 %v3080_v16  ;;  %1074 = vmatpush.bf16.msrb.mxu1 %v3072_v17  ;;  %v3032_v16 = vld [vmem:[%s3905_s26 + $0x24] sm:$0xf]  ;;  %v2762_v17 = vld [vmem:[%s3905_s26 + $0x28] sm:$0xf0] }
  0x81   : > { %v2765_v22 = vor.u32 %v3032_v16, %v2762_v17  ;;  %1753 = vmatpush.bf16.msrb.mxu3 %v3096_v57  ;;  %v3046_v57 = vld [vmem:[%s3905_s26 + $0x94] sm:$0xf] }
  0x84   : > { %1179 = vmatpush.bf16.msrb.mxu2 %v3079_v18  ;;  %1075 = vmatpush.bf16.msrb.mxu1 %v3071_v19  ;;  %v500_v18 = vld [vmem:[%s3913_s23 + $0x40] sm:$0xff]  ;;  %v501_v19 = vld [vmem:[%s3913_s23 + $0x48] sm:$0xff] }
  0x85   : > { %1754 = vmatpush.bf16.msrb.mxu3 %v3095_v60  ;;  %v2818_v60 = vld [vmem:[%s3905_s26 + $0x98] sm:$0xf0] }
  0x88   : > { %1180 = vmatpush.bf16.msrb.mxu2 %v3078_v20  ;;  %1076 = vmatpush.bf16.msrb.mxu1 %v3070_v21  ;;  %v604_v20 = vpack.c.bf16 %v501_v19, %v500_v18  ;;  %v2761_v21 = vor.u32 %v3033_v15, %v2760_v14  ;;  %v3042_v14 = vld [vmem:[%s3905_s26 + $0x74] sm:$0xf]  ;;  %v2802_v15 = vld [vmem:[%s3905_s26 + $0x78] sm:$0xf0]  ;;  %v528_v19 = vld [vmem:[%s3913_s23 + $0x120] sm:$0xff] }
  0x89   : > { %1755 = vmatpush.bf16.msrb.mxu3 %v3094_v8  ;;  %v2805_v18 = vor.u32 %v3042_v14, %v2802_v15 }
  0x8b   : > { %721 = vmatmul.bf16.gmra.mxu1 %v606_v28  ;;  %746 = vmatmul.bf16.gmra.mxu2 %v611_v29 }
  0x8c   : > { %1181 = vmatpush.bf16.msrb.mxu2 %v3077_v26  ;;  %1077 = vmatpush.bf16.msrb.mxu1 %v3069_v27  ;;  %v2770_v26 = vld [vmem:[%s3905_s26 + $0x38] sm:$0xf0]  ;;  %v2769_v27 = vor.u32 %v3035_v24, %v2768_v23  ;;  %v3092_v24 = vld [vmem:[#allocation10 + $0x10] sm:$0xff] }
  0x8d   : > { %696 = vmatmul.bf16.gmra.mxu0 %v601_v53  ;;  %v2773_v28 = vor.u32 %v3034_v25, %v2770_v26  ;;  %v524_v53 = vld [vmem:[%s3913_s23 + $0x100] sm:$0xff] }
  0x8e   : > { %v616_v56 = vpack.c.bf16 %v525_v54, %v524_v53  ;;  %v2816_v54 = vld [vmem:[%s3905_s26 + $0x90] sm:$0xf] }
  0x90   : > { %1182 = vmatpush.bf16.msrb.mxu2 %v3076_v30  ;;  %1078 = vmatpush.bf16.msrb.mxu1 %v3068_v31 }
  0x94   : > { %1183 = vmatpush.bf16.msrb.mxu2 %v3075_v32  ;;  %1079 = vmatpush.bf16.msrb.mxu1 %v3067_v39  ;;  %v2776_v32 = vld [vmem:[%s3905_s26 + $0x40] sm:$0xf]  ;;  %v522_v39 = vld [vmem:[%s3913_s23 + $0xf0] sm:$0xff] }
  0x98   : > { %1184 = vmatpush.bf16.msrb.mxu2 %v3074_v40  ;;  %1080 = vmatpush.bf16.msrb.mxu1 %v3066_v43  ;;  %v523_v40 = vld [vmem:[%s3913_s23 + $0xf8] sm:$0xff] }
  0x99   : > { %v615_v42 = vpack.c.bf16 %v523_v40, %v522_v39 }
  0x9b   : > { %726 = vmatmul.bf16.gmra.mxu1 %v607_v37  ;;  %751 = vmatmul.bf16.gmra.mxu2 %v612_v38  ;;  %v2777_v37 = vor.u32 %v3037_v33, %v2776_v32  ;;  %v2781_v38 = vor.u32 %v3036_v34, %v2778_v35  ;;  %v3045_v32 = vld [vmem:[%s3905_s26 + $0x84] sm:$0xf0]  ;;  %v3044_v33 = vld [vmem:[%s3905_s26 + $0x84] sm:$0xf]  ;;  %v2810_v34 = vld [vmem:[%s3905_s26 + $0x88] sm:$0xf0] }
  0x9c   : > { %766 = vmatmul.bf16.vlgmr.msra.gmra.mxu3 %v615_v42  ;;  %v2813_v39 = vor.u32 %v3044_v33, %v2810_v34  ;;  %v3090_v42 = vld [vmem:[#allocation10] sm:$0xff]  ;;  %v3049_v33 = vld [vmem:[%s3905_s26 + $0xa4] sm:$0xf0] }
  0x9d   : > { %701 = vmatmul.bf16.gmra.mxu0 %v602_v62  ;;  %v3041_v62 = vld [vmem:[%s3905_s26 + $0x64] sm:$0xf0]  ;;  %v3048_v34 = vld [vmem:[%s3905_s26 + $0xa4] sm:$0xf] }
  0x9e   : > { %v2793_v2 = vor.u32 %v3041_v62, %v2792_v61 }
  0xab   : > { %731 = vmatmul.bf16.gmra.mxu1 %v608_v49  ;;  %756 = vmatmul.bf16.gmra.mxu2 %v613_v50  ;;  %v2786_v49 = vld [vmem:[%s3905_s26 + $0x58] sm:$0xf0] }
  0xac   : > { %v2789_v52 = vor.u32 %v3038_v48, %v2786_v49  ;;  %771 = vmatmul.bf16.gmra.mxu3 %v616_v56  ;;  %v3047_v56 = vld [vmem:[%s3905_s26 + $0x94] sm:$0xf0] }
  0xad   : > { %706 = vmatmul.bf16.gmra.mxu0 %v603_v7 }
  0xbb   : > { %736 = vmatmul.bf16.gmra.mxu1 %v609_v58  ;;  %761 = vmatmul.bf16.gmra.mxu2 %v614_v59 }
  0xbd   : > { %711 = vmatmul.bf16.gmra.mxu0 %v604_v20  ;;  %v529_v20 = vld [vmem:[%s3913_s23 + $0x128] sm:$0xff] }
  0xcb   : > { %1081 = vmatmul.bf16.vlgmr.msrb.gmra.mxu1 %v2745_v3  ;;  %1185 = vmatmul.bf16.vlgmr.msrb.gmra.mxu2 %v2749_v4  ;;  %v2797_v3 = vor.u32 %v3040_v63, %v2794_v0  ;;  %v526_v4 = vld [vmem:[%s3913_s23 + $0x110] sm:$0xff] }
  0xcc   : > { %v617_v7 = vpack.c.bf16 %v527_v5, %v526_v4 }
  0xce   : > { %776 = vmatmul.bf16.gmra.mxu3 %v617_v7 }
  0xdb   : > { %1086 = vmatmul.bf16.gmra.mxu1 %v2753_v12  ;;  %1190 = vmatmul.bf16.gmra.mxu2 %v2757_v13  ;;  %v3093_v12 = vld [vmem:[#allocation10 + $0x18] sm:$0xff] }
  0xdc   : > { %v3043_v13 = vld [vmem:[%s3905_s26 + $0x74] sm:$0xf0]  ;;  %1756 = vmatpush.bf16.msrb.mxu3 %v3093_v12 }
  0xdd   : > { %v2801_v17 = vor.u32 %v3043_v13, %v2800_v11 }
  0xe0   : > { %1757 = vmatpush.bf16.msrb.mxu3 %v3092_v24 }
  0xeb   : > { %1091 = vmatmul.bf16.gmra.mxu1 %v2761_v21  ;;  %1195 = vmatmul.bf16.gmra.mxu2 %v2765_v22  ;;  %v618_v22 = vpack.c.bf16 %v529_v20, %v528_v19 }
  0xed   : > { %781 = vmatmul.bf16.gmra.mxu3 %v618_v22 }
  0xf8   : > { %v3977_v29 = vpop.f32.mrf.mxu1 }
  0xfa   : > { %v692_v23 = vpop.f32.mrf.mxu0 }
  0xfb   : > { %1096 = vmatmul.bf16.gmra.mxu1 %v2769_v27  ;;  %1200 = vmatmul.bf16.gmra.mxu2 %v2773_v28  ;;  %v3091_v27 = vld [vmem:[#allocation10 + $0x8] sm:$0xff]  ;;  %v2808_v28 = vld [vmem:[%s3905_s26 + $0x80] sm:$0xf] }
  0xfc   : > { %1758 = vmatpush.bf16.msrb.mxu3 %v3091_v27  ;;  %v2824_v27 = vld [vmem:[%s3905_s26 + $0xa0] sm:$0xf] }
  0xfe   : > { %v3979_v30 = vpop.f32.mrf.mxu2 }
 0x100   : > { %v3981_v31 = vpop.f32.mrf.mxu1  ;;  %1759 = vmatpush.bf16.msrb.mxu3 %v3090_v42 }
 0x102   : > { %v694_v35 = vpop.f32.mrf.mxu0 }
 0x106   : > { %v3987_v36 = vpop.f32.mrf.mxu2 }
 0x108   : > { %v3991_v41 = vpop.f32.mrf.mxu1 }
 0x10a   : > { %v697_v48 = vpop.f32.mrf.mxu0 }
 0x10b   : > { %1101 = vmatmul.bf16.gmra.mxu1 %v2777_v37  ;;  %1205 = vmatmul.bf16.gmra.mxu2 %v2781_v38  ;;  %v2809_v38 = vor.u32 %v3045_v32, %v2808_v28 }
 0x10e   : > { %v3993_v43 = vpop.f32.mrf.mxu2 }
 0x110   : > { %v3995_v44 = vpop.f32.mrf.mxu1 }
 0x112   : > { %v699_v7 = vpop.f32.mrf.mxu0 }
 0x116   : > { %v4001_v50 = vpop.f32.mrf.mxu2 }
 0x118   : > { %v4005_v55 = vpop.f32.mrf.mxu1 }
 0x11a   : > { %v702_v24 = vpop.f32.mrf.mxu0 }
 0x11b   : > { %1106 = vmatmul.bf16.gmra.mxu1 %v2785_v51  ;;  %1210 = vmatmul.bf16.gmra.mxu2 %v2789_v52 }
 0x11e   : > { %v4007_v58 = vpop.f32.mrf.mxu2 }
 0x120   : > { %v4009_v59 = vpop.f32.mrf.mxu1 }
 0x126   : > { %v4015_v1 = vpop.f32.mrf.mxu2 }
 0x128   : > { %v4019_v6 = vpop.f32.mrf.mxu1 }
 0x12b   : > { %1111 = vmatmul.bf16.gmra.mxu1 %v2793_v2  ;;  %1215 = vmatmul.bf16.gmra.mxu2 %v2797_v3  ;;  %v2817_v2 = vor.u32 %v3047_v56, %v2816_v54  ;;  %v2821_v3 = vor.u32 %v3046_v57, %v2818_v60 }
 0x12e   : > { %v4021_v9 = vpop.f32.mrf.mxu2 }
 0x130   : > { %v4023_v10 = vpop.f32.mrf.mxu1 }
 0x136   : > { %v4029_v16 = vpop.f32.mrf.mxu2 }
 0x138   : > { %v4033_v21 = vpop.f32.mrf.mxu1 }
 0x13b   : > { %1116 = vmatmul.bf16.gmra.mxu1 %v2801_v17  ;;  %1220 = vmatmul.bf16.gmra.mxu2 %v2805_v18 }
 0x13e   : > { %v4035_v25 = vpop.f32.mrf.mxu2 }
 0x140   : > { %v4037_v26 = vpop.f32.mrf.mxu1 }
 0x146   : > { %v4043_v37 = vpop.f32.mrf.mxu2 }
 0x148   : > { %v1082_v40 = vpop.f32.mrf.mxu1 }
 0x149   : > { %v1083_v45 = vadd.f32 %v1082_v40, %v692_v23 }
 0x14b   : > { %1121 = vmatmul.bf16.gmra.mxu1 %v2809_v38  ;;  %1225 = vmatmul.bf16.gmra.mxu2 %v2813_v39 }
 0x14e   : > { %v1186_v47 = vpop.f32.mrf.mxu2 }
 0x14f   : > { %v1187_v49 = vadd.f32 %v1186_v47, %v1083_v45  ;;  %v2825_v47 = vor.u32 %v3049_v33, %v2824_v27 }
 0x150   : > { %v1084_v51 = vpop.f32.mrf.mxu1 }
 0x151   : > { %v1285_v52 = vadd.f32 %v4048_v46, %v1187_v49  ;;  %v1085_v61 = vadd.f32 %v1084_v51, %v694_v35  ;;  %v2826_v35 = vld [vmem:[%s3905_s26 + $0xa8] sm:$0xf0] }
 0x153   : > { %v1361_v53 = vmul.f32 0.044715, %v1285_v52 }
 0x155   : > { %v1399_v62 = vmul.f32 %v1361_v53, %v1285_v52 }
 0x156   : > { %v1188_v63 = vpop.f32.mrf.mxu2 }
 0x157   : > { %v1189_v0 = vadd.f32 %v1188_v63, %v1085_v61  ;;  %v1437_v4 = vmul.f32 %v1399_v62, %v1285_v52  ;;  %v704_v62 = vpop.f32.mrf.mxu0  ;;  %v1323_v63 = vmul.f32 0.5, %v1285_v52 }
 0x158   : > { %v1087_v5 = vpop.f32.mrf.mxu1 }
 0x159   : > { %v1286_v8 = vadd.f32 %v4048_v46, %v1189_v0  ;;  %v1475_v11 = vadd.f32 %v1437_v4, %v1285_v52  ;;  %v1088_v13 = vadd.f32 %v1087_v5, %v697_v48  ;;  %v2829_v48 = vor.u32 %v3048_v34, %v2826_v35  ;;  %v2832_v52 = vld [vmem:[%s3905_s26 + $0xb0] sm:$0xf] }
 0x15b   : > { %v1362_v12 = vmul.f32 0.044715, %v1286_v8  ;;  %1126 = vmatmul.bf16.gmra.mxu1 %v2817_v2  ;;  %1230 = vmatmul.bf16.gmra.mxu2 %v2821_v3  ;;  %v1513_v15 = vmul.f32 0.7978846, %v1475_v11  ;;  %v1324_v0 = vmul.f32 0.5, %v1286_v8 }
 0x15d   : > { %v1400_v14 = vmul.f32 %v1362_v12, %v1286_v8  ;;  %3237 = vtanh.f32 %v1513_v15 }
 0x15e   : > { %v1191_v17 = vpop.f32.mrf.mxu2 }
 0x15f   : > { %v1192_v18 = vadd.f32 %v1191_v17, %v1088_v13  ;;  %v1438_v19 = vmul.f32 %v1400_v14, %v1286_v8 }
 0x160   : > { %v1089_v20 = vpop.f32.mrf.mxu1 }
 0x161   : > { %v4057_v22 = vadd.f32 %v4048_v46, %v1192_v18  ;;  %v1476_v23 = vadd.f32 %v1438_v19, %v1286_v8  ;;  %v1090_v38 = vadd.f32 %v1089_v20, %v699_v7  ;;  %v3051_v20 = vld [vmem:[%s3905_s26 + $0xb4] sm:$0xf0] }
 0x163   : > { %v1514_v28 = vmul.f32 0.7978846, %v1476_v23  ;;  %v1363_v32 = vmul.f32 0.044715, %v4057_v22  ;;  %v3238_v42 = vpop.eup %3237  ;;  %v3050_v23 = vld [vmem:[%s3905_s26 + $0xb4] sm:$0xf] }
 0x164   : > { %v1589_v56 = vadd.f32 1.0, %v3238_v42 }
 0x165   : > { %3239 = vtanh.f32 %v1514_v28  ;;  %v1401_v39 = vmul.f32 %v1363_v32, %v4057_v22  ;;  %v707_v32 = vpop.f32.mrf.mxu0 }
 0x166   : > { %v1193_v40 = vpop.f32.mrf.mxu2  ;;  %v1627_v7 = vmul.f32 %v1589_v56, %v1323_v63  ;;  %v1325_v56 = vmul.f32 0.5, %v4057_v22 }
 0x167   : > { %v1194_v45 = vadd.f32 %v1193_v40, %v1090_v38  ;;  %v1439_v49 = vmul.f32 %v1401_v39, %v4057_v22  ;;  %v2833_v38 = vor.u32 %v3051_v20, %v2832_v52  ;;  %v2842_v52 = vld [vmem:[%s3905_s26 + $0xc8] sm:$0xf0] }
 0x168   : > { %v1092_v51 = vpop.f32.mrf.mxu1 }
 0x169   : > { %v1288_v53 = vadd.f32 %v4048_v46, %v1194_v45  ;;  %v1477_v54 = vadd.f32 %v1439_v49, %v4057_v22  ;;  %v1093_v60 = vadd.f32 %v1092_v51, %v702_v24  ;;  %v2834_v24 = vld [vmem:[%s3905_s26 + $0xb8] sm:$0xf0] }
 0x16a   : > { %v2837_v39 = vor.u32 %v3050_v23, %v2834_v24 }
 0x16b   : > { %v3240_v57 = vpop.eup %3239  ;;  %1131 = vmatmul.bf16.gmra.mxu1 %v2825_v47  ;;  %1235 = vmatmul.bf16.gmra.mxu2 %v2829_v48  ;;  %v1364_v61 = vmul.f32 0.044715, %v1288_v53  ;;  %v1515_v4 = vmul.f32 0.7978846, %v1477_v54 }
 0x16c   : > { %v1590_v2 = vadd.f32 1.0, %v3240_v57  ;;  %v1326_v57 = vmul.f32 0.5, %v1288_v53 }
 0x16d   : > { %v1402_v3 = vmul.f32 %v1364_v61, %v1288_v53  ;;  %3241 = vtanh.f32 %v1515_v4 }
 0x16e   : > { %v1196_v5 = vpop.f32.mrf.mxu2  ;;  %v1628_v11 = vmul.f32 %v1590_v2, %v1324_v0 }
 0x16f   : > { %v1197_v12 = vadd.f32 %v1196_v5, %v1093_v60  ;;  %v1440_v13 = vmul.f32 %v1402_v3, %v1288_v53  ;;  %v709_v5 = vpop.f32.mrf.mxu0 }
 0x170   : > { %v1094_v14 = vpop.f32.mrf.mxu1  ;;  %v1665_v15 = vpack.c.bf16 %v1628_v11, %v1627_v7 }
 0x171   : > { %v4069_v17 = vadd.f32 %v4048_v46, %v1197_v12  ;;  %v1478_v18 = vadd.f32 %v1440_v13, %v1288_v53  ;;  %v1095_v27 = vadd.f32 %v1094_v14, %v704_v62  ;;  %v2840_v53 = vld [vmem:[%s3905_s26 + $0xc0] sm:$0xf] }
 0x172   : > { %1760 = vmatmul.bf16.vlgmr.msrb.gmra.mxu3 %v1665_v15  ;;  %v3053_v15 = vld [vmem:[%s3905_s26 + $0xc4] sm:$0xf0] }
 0x173   : > { %v1516_v8 = vmul.f32 0.7978846, %v1478_v18  ;;  %v1365_v19 = vmul.f32 0.044715, %v4069_v17  ;;  %v3242_v34 = vpop.eup %3241  ;;  %v3052_v18 = vld [vmem:[%s3905_s26 + $0xc4] sm:$0xf] }
 0x174   : > { %v1591_v48 = vadd.f32 1.0, %v3242_v34 }
 0x175   : > { %3243 = vtanh.f32 %v1516_v8  ;;  %v1403_v28 = vmul.f32 %v1365_v19, %v4069_v17 }
 0x176   : > { %v1198_v33 = vpop.f32.mrf.mxu2  ;;  %v1629_v0 = vmul.f32 %v1591_v48, %v1325_v56  ;;  %v1327_v48 = vmul.f32 0.5, %v4069_v17 }
 0x177   : > { %v1199_v35 = vadd.f32 %v1198_v33, %v1095_v27  ;;  %v1441_v40 = vmul.f32 %v1403_v28, %v4069_v17  ;;  %v2841_v27 = vor.u32 %v3053_v15, %v2840_v53  ;;  %v2845_v28 = vor.u32 %v3052_v18, %v2842_v52  ;;  %v2850_v53 = vld [vmem:[%s3905_s26 + $0xd8] sm:$0xf0] }
 0x178   : > { %v1097_v42 = vpop.f32.mrf.mxu1 }
 0x179   : > { %v1290_v45 = vadd.f32 %v4048_v46, %v1199_v35  ;;  %v1479_v47 = vadd.f32 %v1441_v40, %v4069_v17  ;;  %v1098_v51 = vadd.f32 %v1097_v42, %v707_v32  ;;  %v2848_v17 = vld [vmem:[%s3905_s26 + $0xd0] sm:$0xf] }
 0x17b   : > { %v3244_v49 = vpop.eup %3243  ;;  %1136 = vmatmul.bf16.gmra.mxu1 %v2833_v38  ;;  %1240 = vmatmul.bf16.gmra.mxu2 %v2837_v39  ;;  %v1366_v54 = vmul.f32 0.044715, %v1290_v45  ;;  %v1517_v62 = vmul.f32 0.7978846, %v1479_v47  ;;  %v712_v38 = vpop.f32.mrf.mxu0 }
 0x17c   : > { %v1592_v60 = vadd.f32 1.0, %v3244_v49  ;;  %v1328_v49 = vmul.f32 0.5, %v1290_v45 }
 0x17d   : > { %v1404_v61 = vmul.f32 %v1366_v54, %v1290_v45  ;;  %3245 = vtanh.f32 %v1517_v62 }
 0x17e   : > { %v1201_v63 = vpop.f32.mrf.mxu2  ;;  %v1630_v2 = vmul.f32 %v1592_v60, %v1326_v57 }
 0x17f   : > { %v1202_v3 = vadd.f32 %v1201_v63, %v1098_v51  ;;  %v1442_v4 = vmul.f32 %v1404_v61, %v1290_v45 }
 0x180   : > { %v1099_v7 = vpop.f32.mrf.mxu1  ;;  %v1666_v11 = vpack.c.bf16 %v1630_v2, %v1629_v0 }
 0x181   : > { %v4082_v12 = vadd.f32 %v4048_v46, %v1202_v3  ;;  %v1480_v22 = vadd.f32 %v1442_v4, %v1290_v45  ;;  %v1100_v8 = vadd.f32 %v1099_v7, %v709_v5 }
 0x182   : > { %1765 = vmatmul.bf16.gmra.mxu3 %v1666_v11  ;;  %v3055_v11 = vld [vmem:[%s3905_s26 + $0xd4] sm:$0xf0] }
 0x183   : > { %v1518_v13 = vmul.f32 0.7978846, %v1480_v22  ;;  %v1367_v14 = vmul.f32 0.044715, %v4082_v12  ;;  %v3246_v23 = vpop.eup %3245  ;;  %v714_v7 = vpop.f32.mrf.mxu0  ;;  %v3054_v22 = vld [vmem:[%s3905_s26 + $0xd4] sm:$0xf] }
 0x184   : > { %v1593_v39 = vadd.f32 1.0, %v3246_v23 }
 0x185   : > { %3247 = vtanh.f32 %v1518_v13  ;;  %v1405_v19 = vmul.f32 %v1367_v14, %v4082_v12 }
 0x186   : > { %v1203_v20 = vpop.f32.mrf.mxu2  ;;  %v1631_v60 = vmul.f32 %v1593_v39, %v1327_v48 }
 0x187   : > { %v1204_v24 = vadd.f32 %v1203_v20, %v1100_v8  ;;  %v1443_v32 = vmul.f32 %v1405_v19, %v4082_v12  ;;  %v2849_v8 = vor.u32 %v3055_v11, %v2848_v17  ;;  %v2853_v19 = vor.u32 %v3054_v22, %v2850_v53  ;;  %v4118_v53 = vpop.f32.mrf.mxu3 }
 0x188   : > { %v1102_v33 = vpop.f32.mrf.mxu1 }
 0x189   : > { %v1292_v34 = vadd.f32 %v4048_v46, %v1204_v24  ;;  %v1481_v35 = vadd.f32 %v1443_v32, %v4082_v12  ;;  %v1103_v42 = vadd.f32 %v1102_v33, %v712_v38 }
 0x18b   : > { %v3248_v40 = vpop.eup %3247  ;;  %1141 = vmatmul.bf16.gmra.mxu1 %v2841_v27  ;;  %1245 = vmatmul.bf16.gmra.mxu2 %v2845_v28  ;;  %v1368_v47 = vmul.f32 0.044715, %v1292_v34  ;;  %v1519_v56 = vmul.f32 0.7978846, %v1481_v35  ;;  %v1329_v35 = vmul.f32 0.5, %v4082_v12  ;;  %v1330_v38 = vmul.f32 0.5, %v1292_v34 }
 0x18c   : > { %v1594_v51 = vadd.f32 1.0, %v3248_v40 }
 0x18d   : > { %v1406_v54 = vmul.f32 %v1368_v47, %v1292_v34  ;;  %3249 = vtanh.f32 %v1519_v56 }
 0x18e   : > { %v1206_v57 = vpop.f32.mrf.mxu2  ;;  %v1632_v61 = vmul.f32 %v1594_v51, %v1328_v49 }
 0x18f   : > { %v1207_v62 = vadd.f32 %v1206_v57, %v1103_v42  ;;  %v1444_v63 = vmul.f32 %v1406_v54, %v1292_v34 }
 0x190   : > { %v1104_v0 = vpop.f32.mrf.mxu1  ;;  %v1667_v2 = vpack.c.bf16 %v1632_v61, %v1631_v60 }
 0x191   : > { %v4095_v3 = vadd.f32 %v4048_v46, %v1207_v62  ;;  %v1482_v4 = vadd.f32 %v1444_v63, %v1292_v34  ;;  %v1105_v13 = vadd.f32 %v1104_v0, %v714_v7  ;;  %v2856_v34 = vld [vmem:[%s3905_s26 + $0xe0] sm:$0xf]  ;;  %v3057_v63 = vld [vmem:[%s3905_s26 + $0xe4] sm:$0xf0]  ;;  %v3056_v0 = vld [vmem:[%s3905_s26 + $0xe4] sm:$0xf] }
 0x192   : > { %1770 = vmatmul.bf16.gmra.mxu3 %v1667_v2  ;;  %v2858_v2 = vld [vmem:[%s3905_s26 + $0xe8] sm:$0xf0]  ;;  %v2857_v11 = vor.u32 %v3057_v63, %v2856_v34 }
 0x193   : > { %v1520_v45 = vmul.f32 0.7978846, %v1482_v4  ;;  %v1369_v5 = vmul.f32 0.044715, %v4095_v3  ;;  %v3250_v18 = vpop.eup %3249  ;;  %v2861_v22 = vor.u32 %v3056_v0, %v2858_v2 }
 0x194   : > { %v1595_v28 = vadd.f32 1.0, %v3250_v18 }
 0x195   : > { %3251 = vtanh.f32 %v1520_v45  ;;  %v1407_v14 = vmul.f32 %v1369_v5, %v4095_v3 }
 0x196   : > { %v1208_v15 = vpop.f32.mrf.mxu2  ;;  %v1633_v49 = vmul.f32 %v1595_v28, %v1329_v35 }
 0x197   : > { %v1209_v52 = vadd.f32 %v1208_v15, %v1105_v13  ;;  %v1445_v20 = vmul.f32 %v1407_v14, %v4095_v3 }
 0x198   : > { %v1107_v23 = vpop.f32.mrf.mxu1 }
 0x199   : > { %v1294_v24 = vadd.f32 %v4048_v46, %v1209_v52  ;;  %v1483_v27 = vadd.f32 %v1445_v20, %v4095_v3  ;;  %v1108_v40 = vadd.f32 %v1107_v23, %v3977_v29  ;;  %v3105_v52 = vld [vmem:[#allocation11 + $0x38] sm:$0xff]  ;;  %v1331_v20 = vmul.f32 0.5, %v4095_v3 }
 0x19a   : > { %2281 = vmatpush.bf16.msrb.mxu0 %v3105_v52 }
 0x19b   : > { %v3252_v32 = vpop.eup %3251  ;;  %1146 = vmatmul.bf16.gmra.mxu1 %v2849_v8  ;;  %1250 = vmatmul.bf16.gmra.mxu2 %v2853_v19  ;;  %v1370_v33 = vmul.f32 0.044715, %v1294_v24  ;;  %v1521_v47 = vmul.f32 0.7978846, %v1483_v27  ;;  %v1332_v23 = vmul.f32 0.5, %v1294_v24 }
 0x19c   : > { %v1596_v39 = vadd.f32 1.0, %v3252_v32 }
 0x19d   : > { %v1408_v42 = vmul.f32 %v1370_v33, %v1294_v24  ;;  %3253 = vtanh.f32 %v1521_v47 }
 0x19e   : > { %v1211_v48 = vpop.f32.mrf.mxu2  ;;  %v1634_v51 = vmul.f32 %v1596_v39, %v1330_v38 }
 0x19f   : > { %v1212_v54 = vadd.f32 %v1211_v48, %v1108_v40  ;;  %v1446_v56 = vmul.f32 %v1408_v42, %v1294_v24 }
 0x1a0   : > { %v1109_v57 = vpop.f32.mrf.mxu1  ;;  %v1668_v60 = vpack.c.bf16 %v1634_v51, %v1633_v49 }
 0x1a1   : > { %v4109_v61 = vadd.f32 %v4048_v46, %v1212_v54  ;;  %v1484_v12 = vadd.f32 %v1446_v56, %v1294_v24  ;;  %v1110_v4 = vadd.f32 %v1109_v57, %v3981_v31  ;;  %v4128_v24 = vpop.f32.mrf.mxu3  ;;  %v3104_v54 = vld [vmem:[#allocation11 + $0x30] sm:$0xff]  ;;  %v3059_v57 = vld [vmem:[%s3905_s26 + $0xf4] sm:$0xf0] }
 0x1a2   : > { %1775 = vmatmul.bf16.gmra.mxu3 %v1668_v60  ;;  %v3058_v60 = vld [vmem:[%s3905_s26 + $0xf4] sm:$0xf]  ;;  %2282 = vmatpush.bf16.msrb.mxu0 %v3104_v54 }
 0x1a3   : > { %v1522_v29 = vmul.f32 0.7978846, %v1484_v12  ;;  %v1371_v62 = vmul.f32 0.044715, %v4109_v61  ;;  %v3254_v5 = vpop.eup %3253  ;;  %v2866_v12 = vld [vmem:[%s3905_s26 + $0xf8] sm:$0xf0] }
 0x1a4   : > { %v1597_v8 = vadd.f32 1.0, %v3254_v5 }
 0x1a5   : > { %3255 = vtanh.f32 %v1522_v29  ;;  %v1409_v17 = vmul.f32 %v1371_v62, %v4109_v61 }
 0x1a6   : > { %v1213_v45 = vpop.f32.mrf.mxu2  ;;  %v1635_v38 = vmul.f32 %v1597_v8, %v1331_v20 }
 0x1a7   : > { %v1214_v7 = vadd.f32 %v1213_v45, %v1110_v4  ;;  %v1447_v13 = vmul.f32 %v1409_v17, %v4109_v61  ;;  %v2869_v4 = vor.u32 %v3058_v60, %v2866_v12 }
 0x1a8   : > { %v1112_v14 = vpop.f32.mrf.mxu1 }
 0x1a9   : > { %v1296_v15 = vadd.f32 %v4048_v46, %v1214_v7  ;;  %v1485_v18 = vadd.f32 %v1447_v13, %v4109_v61  ;;  %v1113_v28 = vadd.f32 %v1112_v14, %v3991_v41  ;;  %v2864_v41 = vld [vmem:[%s3905_s26 + $0xf0] sm:$0xf]  ;;  %v3103_v14 = vld [vmem:[#allocation11 + $0x28] sm:$0xff] }
 0x1aa   : > { %v2865_v2 = vor.u32 %v3059_v57, %v2864_v41  ;;  %2283 = vmatpush.bf16.msrb.mxu0 %v3103_v14 }
 0x1ab   : > { %v3256_v31 = vpop.eup %3255  ;;  %1151 = vmatmul.bf16.gmra.mxu1 %v2857_v11  ;;  %1255 = vmatmul.bf16.gmra.mxu2 %v2861_v22  ;;  %v1372_v19 = vmul.f32 0.044715, %v1296_v15  ;;  %v1523_v33 = vmul.f32 0.7978846, %v1485_v18  ;;  %v1333_v18 = vmul.f32 0.5, %v4109_v61  ;;  %v1334_v52 = vmul.f32 0.5, %v1296_v15 }
 0x1ac   : > { %v1598_v27 = vadd.f32 1.0, %v3256_v31 }
 0x1ad   : > { %v1410_v32 = vmul.f32 %v1372_v19, %v1296_v15  ;;  %3257 = vtanh.f32 %v1523_v33 }
 0x1ae   : > { %v1216_v35 = vpop.f32.mrf.mxu2  ;;  %v1636_v39 = vmul.f32 %v1598_v27, %v1332_v23 }
 0x1af   : > { %v1217_v40 = vadd.f32 %v1216_v35, %v1113_v28  ;;  %v1448_v42 = vmul.f32 %v1410_v32, %v1296_v15 }
 0x1b0   : > { %v1114_v47 = vpop.f32.mrf.mxu1  ;;  %v1669_v48 = vpack.c.bf16 %v1636_v39, %v1635_v38 }
 0x1b1   : > { %v4126_v3 = vadd.f32 %v4048_v46, %v1217_v40  ;;  %v1486_v49 = vadd.f32 %v1448_v42, %v1296_v15  ;;  %v1115_v34 = vadd.f32 %v1114_v47, %v3995_v44  ;;  %v4140_v44 = vpop.f32.mrf.mxu3  ;;  %v3102_v42 = vld [vmem:[#allocation11 + $0x20] sm:$0xff]  ;;  %v3061_v47 = vld [vmem:[%s3905_s26 + $0x104] sm:$0xf0] }
 0x1b2   : > { %1780 = vmatmul.bf16.gmra.mxu3 %v1669_v48  ;;  %v3060_v48 = vld [vmem:[%s3905_s26 + $0x104] sm:$0xf]  ;;  %2284 = vmatpush.bf16.msrb.mxu0 %v3102_v42 }
 0x1b3   : > { %v1524_v51 = vmul.f32 0.7978846, %v1486_v49  ;;  %v1373_v56 = vmul.f32 0.044715, %v4126_v3  ;;  %v3258_v63 = vpop.eup %3257  ;;  %v2874_v49 = vld [vmem:[%s3905_s26 + $0x108] sm:$0xf0] }
 0x1b4   : > { %v1599_v11 = vadd.f32 1.0, %v3258_v63 }
 0x1b5   : > { %3259 = vtanh.f32 %v1524_v51  ;;  %v1411_v29 = vmul.f32 %v1373_v56, %v4126_v3 }
 0x1b6   : > { %v1218_v62 = vpop.f32.mrf.mxu2  ;;  %v1637_v27 = vmul.f32 %v1599_v11, %v1333_v18 }
 0x1b7   : > { %v1219_v0 = vadd.f32 %v1218_v62, %v1115_v34  ;;  %v1449_v17 = vmul.f32 %v1411_v29, %v4126_v3  ;;  %v2877_v34 = vor.u32 %v3060_v48, %v2874_v49 }
 0x1b8   : > { %v1117_v45 = vpop.f32.mrf.mxu1 }
 0x1b9   : > { %v1298_v5 = vadd.f32 %v4048_v46, %v1219_v0  ;;  %v1487_v7 = vadd.f32 %v1449_v17, %v4126_v3  ;;  %v1118_v31 = vadd.f32 %v1117_v45, %v4005_v55  ;;  %v2872_v55 = vld [vmem:[%s3905_s26 + $0x100] sm:$0xf]  ;;  %v4153_v51 = vpop.f32.mrf.mxu3  ;;  %v1335_v17 = vmul.f32 0.5, %v4126_v3 }
 0x1ba   : > { %v2873_v12 = vor.u32 %v3061_v47, %v2872_v55 }
 0x1bb   : > { %v3260_v22 = vpop.eup %3259  ;;  %1156 = vmatmul.bf16.gmra.mxu1 %v2865_v2  ;;  %1260 = vmatmul.bf16.gmra.mxu2 %v2869_v4  ;;  %v1374_v13 = vmul.f32 0.044715, %v1298_v5  ;;  %v1525_v20 = vmul.f32 0.7978846, %v1487_v7  ;;  %v1336_v45 = vmul.f32 0.5, %v1298_v5 }
 0x1bc   : > { %v1600_v8 = vadd.f32 1.0, %v3260_v22 }
 0x1bd   : > { %v1412_v19 = vmul.f32 %v1374_v13, %v1298_v5  ;;  %3261 = vtanh.f32 %v1525_v20 }
 0x1be   : > { %v1221_v23 = vpop.f32.mrf.mxu2  ;;  %v1638_v28 = vmul.f32 %v1600_v8, %v1334_v52 }
 0x1bf   : > { %v1222_v32 = vadd.f32 %v1221_v23, %v1118_v31  ;;  %v1450_v33 = vmul.f32 %v1412_v19, %v1298_v5 }
 0x1c0   : > { %v1119_v35 = vpop.f32.mrf.mxu1  ;;  %v1670_v38 = vpack.c.bf16 %v1638_v28, %v1637_v27 }
 0x1c1   : > { %v4145_v61 = vadd.f32 %v4048_v46, %v1222_v32  ;;  %v1488_v15 = vadd.f32 %v1450_v33, %v1298_v5  ;;  %v1120_v41 = vadd.f32 %v1119_v35, %v4009_v59  ;;  %v4161_v8 = vpop.f32.mrf.mxu3  ;;  %v3101_v32 = vld [vmem:[#allocation11 + $0x18] sm:$0xff]  ;;  %v3062_v35 = vld [vmem:[%s3905_s26 + $0x114] sm:$0xf] }
 0x1c2   : > { %1785 = vmatmul.bf16.gmra.mxu3 %v1670_v38  ;;  %v3063_v33 = vld [vmem:[%s3905_s26 + $0x114] sm:$0xf0]  ;;  %v2882_v38 = vld [vmem:[%s3905_s26 + $0x118] sm:$0xf0]  ;;  %2285 = vmatpush.bf16.msrb.mxu0 %v3101_v32 }
 0x1c3   : > { %v1526_v39 = vmul.f32 0.7978846, %v1488_v15  ;;  %v1375_v40 = vmul.f32 0.044715, %v4145_v61  ;;  %v3262_v57 = vpop.eup %3261  ;;  %v2885_v48 = vor.u32 %v3062_v35, %v2882_v38 }
 0x1c4   : > { %v1601_v2 = vadd.f32 1.0, %v3262_v57 }
 0x1c5   : > { %3263 = vtanh.f32 %v1526_v39  ;;  %v1413_v54 = vmul.f32 %v1375_v40, %v4145_v61 }
 0x1c6   : > { %v1223_v56 = vpop.f32.mrf.mxu2  ;;  %v1639_v18 = vmul.f32 %v1601_v2, %v1335_v17 }
 0x1c7   : > { %v1224_v60 = vadd.f32 %v1223_v56, %v1120_v41  ;;  %v1451_v29 = vmul.f32 %v1413_v54, %v4145_v61 }
 0x1c8   : > { %v1122_v62 = vpop.f32.mrf.mxu1 }
 0x1c9   : > { %v1300_v63 = vadd.f32 %v4048_v46, %v1224_v60  ;;  %v1489_v0 = vadd.f32 %v1451_v29, %v4145_v61  ;;  %v1123_v11 = vadd.f32 %v1122_v62, %v4019_v6  ;;  %v2880_v6 = vld [vmem:[%s3905_s26 + $0x110] sm:$0xf]  ;;  %v4174_v54 = vpop.f32.mrf.mxu3  ;;  %v1337_v29 = vmul.f32 0.5, %v4145_v61 }
 0x1ca   : > { %v2881_v47 = vor.u32 %v3063_v33, %v2880_v6 }
 0x1cb   : > { %v3264_v59 = vpop.eup %3263  ;;  %1161 = vmatmul.bf16.gmra.mxu1 %v2873_v12  ;;  %1265 = vmatmul.bf16.gmra.mxu2 %v2877_v34  ;;  %v1376_v4 = vmul.f32 0.044715, %v1300_v63  ;;  %v1527_v13 = vmul.f32 0.7978846, %v1489_v0  ;;  %v3100_v34 = vld [vmem:[#allocation11 + $0x10] sm:$0xff]  ;;  %v1338_v62 = vmul.f32 0.5, %v1300_v63 }
 0x1cc   : > { %v1602_v7 = vadd.f32 1.0, %v3264_v59  ;;  %2286 = vmatpush.bf16.msrb.mxu0 %v3100_v34 }
 0x1cd   : > { %v1414_v22 = vmul.f32 %v1376_v4, %v1300_v63  ;;  %3265 = vtanh.f32 %v1527_v13 }
 0x1ce   : > { %v1226_v14 = vpop.f32.mrf.mxu2  ;;  %v1640_v52 = vmul.f32 %v1602_v7, %v1336_v45 }
 0x1cf   : > { %v1227_v31 = vadd.f32 %v1226_v14, %v1123_v11  ;;  %v1452_v19 = vmul.f32 %v1414_v22, %v1300_v63 }
 0x1d0   : > { %v1124_v20 = vpop.f32.mrf.mxu1  ;;  %v1671_v23 = vpack.c.bf16 %v1640_v52, %v1639_v18 }
 0x1d1   : > { %v4164_v3 = vadd.f32 %v4048_v46, %v1227_v31  ;;  %v1490_v5 = vadd.f32 %v1452_v19, %v1300_v63  ;;  %v1125_v15 = vadd.f32 %v1124_v20, %v4023_v10  ;;  %v4184_v18 = vpop.f32.mrf.mxu3  ;;  %v3099_v19 = vld [vmem:[#allocation11 + $0x8] sm:$0xff] }
 0x1d2   : > { %1790 = vmatmul.bf16.gmra.mxu3 %v1671_v23  ;;  %v3065_v20 = vld [vmem:[%s3905_s26 + $0x124] sm:$0xf0]  ;;  %v3064_v23 = vld [vmem:[%s3905_s26 + $0x124] sm:$0xf]  ;;  %2287 = vmatpush.bf16.msrb.mxu0 %v3099_v19 }
 0x1d3   : > { %v1377_v27 = vmul.f32 0.044715, %v4164_v3  ;;  %v1528_v28 = vmul.f32 0.7978846, %v1490_v5  ;;  %v3266_v40 = vpop.eup %3265  ;;  %v2890_v5 = vld [vmem:[%s3905_s26 + $0x128] sm:$0xf0] }
 0x1d4   : > { %v1603_v60 = vadd.f32 1.0, %v3266_v40  ;;  %v2893_v38 = vor.u32 %v3064_v23, %v2890_v5 }
 0x1d5   : > { %3267 = vtanh.f32 %v1528_v28  ;;  %v1415_v55 = vmul.f32 %v1377_v27, %v4164_v3 }
 0x1d6   : > { %v1228_v39 = vpop.f32.mrf.mxu2  ;;  %v1641_v45 = vmul.f32 %v1603_v60, %v1337_v29 }
 0x1d7   : > { %v1229_v42 = vadd.f32 %v1228_v39, %v1125_v15  ;;  %v1453_v49 = vmul.f32 %v1415_v55, %v4164_v3 }
 0x1d8   : > { %v1127_v41 = vpop.f32.mrf.mxu1 }
 0x1d9   : > { %v1302_v56 = vadd.f32 %v4048_v46, %v1229_v42  ;;  %v1491_v57 = vadd.f32 %v1453_v49, %v4164_v3  ;;  %v1128_v2 = vadd.f32 %v1127_v41, %v4033_v21  ;;  %v2888_v21 = vld [vmem:[%s3905_s26 + $0x120] sm:$0xf] }
 0x1da   : > { %v2889_v35 = vor.u32 %v3065_v20, %v2888_v21 }
 0x1db   : > { %v3268_v10 = vpop.eup %3267  ;;  %v1378_v12 = vmul.f32 0.044715, %v1302_v56  ;;  %1166 = vmatmul.bf16.gmra.mxu1 %v2881_v47  ;;  %1270 = vmatmul.bf16.gmra.mxu2 %v2885_v48  ;;  %v1529_v4 = vmul.f32 0.7978846, %v1491_v57  ;;  %v1340_v49 = vmul.f32 0.5, %v1302_v56  ;;  %v4196_v57 = vpop.f32.mrf.mxu3 }
 0x1dc   : > { %v1604_v0 = vadd.f32 1.0, %v3268_v10 }
 0x1dd   : > { %v1416_v59 = vmul.f32 %v1378_v12, %v1302_v56  ;;  %3269 = vtanh.f32 %v1529_v4 }
 0x1de   : > { %v1231_v17 = vpop.f32.mrf.mxu2  ;;  %v1642_v7 = vmul.f32 %v1604_v0, %v1338_v62  ;;  %v3098_v0 = vld [vmem:[#allocation11] sm:$0xff] }
 0x1df   : > { %v1232_v11 = vadd.f32 %v1231_v17, %v1128_v2  ;;  %v1454_v22 = vmul.f32 %v1416_v59, %v1302_v56  ;;  %2288 = vmatpush.bf16.msrb.mxu0 %v3098_v0 }
 0x1e0   : > { %v1129_v13 = vpop.f32.mrf.mxu1  ;;  %v1672_v14 = vpack.c.bf16 %v1642_v7, %v1641_v45 }
 0x1e1   : > { %v4181_v61 = vadd.f32 %v4048_v46, %v1232_v11  ;;  %v1492_v63 = vadd.f32 %v1454_v22, %v1302_v56  ;;  %v1130_v6 = vadd.f32 %v1129_v13, %v4037_v26  ;;  %v1339_v26 = vmul.f32 0.5, %v4164_v3 }
 0x1e2   : > { %1795 = vmatmul.bf16.gmra.mxu3 %v1672_v14 }
 0x1e3   : > { %v1379_v52 = vmul.f32 0.044715, %v4181_v61  ;;  %v1530_v31 = vmul.f32 0.7978846, %v1492_v63  ;;  %v3270_v32 = vpop.eup %3269 }
 0x1e4   : > { %v1605_v42 = vadd.f32 1.0, %v3270_v32  ;;  %v1341_v32 = vmul.f32 0.5, %v4181_v61 }
 0x1e5   : > { %3271 = vtanh.f32 %v1530_v31  ;;  %v1417_v27 = vmul.f32 %v1379_v52, %v4181_v61 }
 0x1e6   : > { %v1233_v28 = vpop.f32.mrf.mxu2  ;;  %v1643_v29 = vmul.f32 %v1605_v42, %v1339_v26 }
 0x1e7   : > { %v1234_v33 = vadd.f32 %v1233_v28, %v1130_v6  ;;  %v1455_v15 = vmul.f32 %v1417_v27, %v4181_v61 }
 0x1e8   : > { %v1132_v55 = vpop.f32.mrf.mxu1 }
 0x1e9   : > { %v1304_v39 = vadd.f32 %v4048_v46, %v1234_v33  ;;  %v1493_v40 = vadd.f32 %v1455_v15, %v4181_v61  ;;  %v1133_v60 = vadd.f32 %v1132_v55, %v3979_v30  ;;  %v4205_v30 = vld [vmem:[%s4731_s6] ss:$0 sm:$0xff] }
 0x1eb   : > { %v3272_v47 = vpop.eup %3271  ;;  %v1380_v48 = vmul.f32 0.044715, %v1304_v39  ;;  %1171 = vmatmul.bf16.gmra.mxu1 %v2889_v35  ;;  %1275 = vmatmul.bf16.gmra.mxu2 %v2893_v38  ;;  %v1531_v12 = vmul.f32 0.7978846, %v1493_v40  ;;  %v1342_v33 = vmul.f32 0.5, %v1304_v39 }
 0x1ec   : > { %v1606_v41 = vadd.f32 1.0, %v3272_v47 }
 0x1ed   : > { %v1418_v10 = vmul.f32 %v1380_v48, %v1304_v39  ;;  %3273 = vtanh.f32 %v1531_v12 }
 0x1ee   : > { %v1236_v34 = vpop.f32.mrf.mxu2  ;;  %v1644_v62 = vmul.f32 %v1606_v41, %v1340_v49 }
 0x1ef   : > { %v1237_v2 = vadd.f32 %v1236_v34, %v1133_v60  ;;  %v1456_v59 = vmul.f32 %v1418_v10, %v1304_v39 }
 0x1f0   : > { %v1134_v4 = vpop.f32.mrf.mxu1  ;;  %v1673_v17 = vpack.c.bf16 %v1644_v62, %v1643_v29 }
 0x1f1   : > { %v4200_v45 = vadd.f32 %v4048_v46, %v1237_v2  ;;  %v1494_v3 = vadd.f32 %v1456_v59, %v1304_v39  ;;  %v1135_v11 = vadd.f32 %v1134_v4, %v3987_v36 }
 0x1f2   : > { %1800 = vmatmul.bf16.gmra.mxu3 %v1673_v17 }
 0x1f3   : > { %v1381_v56 = vmul.f32 0.044715, %v4200_v45  ;;  %v1532_v7 = vmul.f32 0.7978846, %v1494_v3  ;;  %v3274_v21 = vpop.eup %3273 }
 0x1f4   : > { %v1607_v6 = vadd.f32 1.0, %v3274_v21 }
 0x1f5   : > { %v1761_v22 = vpop.f32.mrf.mxu3  ;;  %3275 = vtanh.f32 %v1532_v7  ;;  %v1419_v13 = vmul.f32 %v1381_v56, %v4200_v45 }
 0x1f6   : > { %v4211_v14 = vadd.f32 %v4205_v30, %v1761_v22  ;;  %v1238_v63 = vpop.f32.mrf.mxu2  ;;  %v1645_v26 = vmul.f32 %v1607_v6, %v1341_v32 }
 0x1f7   : > { %v1239_v52 = vadd.f32 %v1238_v63, %v1135_v11  ;;  %v1457_v31 = vmul.f32 %v1419_v13, %v4200_v45 }
 0x1f8   : > { %v1894_v19 = vmul.f32 0.044715, %v4211_v14  ;;  %v1137_v20 = vpop.f32.mrf.mxu1 }
 0x1f9   : > { %v1306_v23 = vadd.f32 %v4048_v46, %v1239_v52  ;;  %v1495_v5 = vadd.f32 %v1457_v31, %v4200_v45  ;;  %v1138_v15 = vadd.f32 %v1137_v20, %v3993_v43 }
 0x1fa   : > { %v1932_v36 = vmul.f32 %v1894_v19, %v4211_v14 }
 0x1fb   : > { %v3276_v27 = vpop.eup %3275  ;;  %v1382_v28 = vmul.f32 0.044715, %v1306_v23  ;;  %v1533_v42 = vmul.f32 0.7978846, %v1495_v5  ;;  %v1344_v32 = vmul.f32 0.5, %v1306_v23 }
 0x1fc   : > { %v1608_v35 = vadd.f32 1.0, %v3276_v27  ;;  %v1970_v38 = vmul.f32 %v1932_v36, %v4211_v14 }
 0x1fd   : > { %v1763_v55 = vpop.f32.mrf.mxu3  ;;  %v1420_v40 = vmul.f32 %v1382_v28, %v1306_v23  ;;  %3277 = vtanh.f32 %v1533_v42  ;;  %v1343_v28 = vmul.f32 0.5, %v4200_v45 }
 0x1fe   : > { %v1764_v47 = vadd.f32 %v4205_v30, %v1763_v55  ;;  %v1241_v48 = vpop.f32.mrf.mxu2  ;;  %v1646_v49 = vmul.f32 %v1608_v35, %v1342_v33  ;;  %v2008_v41 = vadd.f32 %v1970_v38, %v4211_v14 }
 0x1ff   : > { %v1242_v60 = vadd.f32 %v1241_v48, %v1138_v15  ;;  %v1458_v10 = vmul.f32 %v1420_v40, %v1306_v23 }
 0x200   : > { %v1895_v12 = vmul.f32 0.044715, %v1764_v47  ;;  %v1139_v61 = vpop.f32.mrf.mxu1  ;;  %v1674_v39 = vpack.c.bf16 %v1646_v49, %v1645_v26  ;;  %v2046_v62 = vmul.f32 0.7978846, %v2008_v41 }
 0x201   : > { %v4224_v34 = vadd.f32 %v4048_v46, %v1242_v60  ;;  %v1496_v29 = vadd.f32 %v1458_v10, %v1306_v23  ;;  %v1140_v4 = vadd.f32 %v1139_v61, %v4001_v50  ;;  %v1857_v61 = vmul.f32 0.5, %v1764_v47 }
 0x202   : > { %v1933_v43 = vmul.f32 %v1895_v12, %v1764_v47  ;;  %1805 = vmatmul.bf16.gmra.mxu3 %v1674_v39 }
 0x203   : > { %v1383_v0 = vmul.f32 0.044715, %v4224_v34  ;;  %v1534_v2 = vmul.f32 0.7978846, %v1496_v29  ;;  %v3278_v22 = vpop.eup %3277  ;;  %v4254_v29 = vld [vmem:[%s4729_s4] ss:$0 sm:$0xff] }
 0x204   : > { %v1971_v59 = vmul.f32 %v1933_v43, %v1764_v47  ;;  %v1609_v20 = vadd.f32 1.0, %v3278_v22 }
 0x205   : > { %v1766_v17 = vpop.f32.mrf.mxu3  ;;  %3279 = vtanh.f32 %v1534_v2  ;;  %v1421_v3 = vmul.f32 %v1383_v0, %v4224_v34 }
 0x206   : > { %v4230_v56 = vadd.f32 %v4205_v30, %v1766_v17  ;;  %v1243_v7 = vpop.f32.mrf.mxu2  ;;  %v2009_v11 = vadd.f32 %v1971_v59, %v1764_v47  ;;  %3281 = vtanh.f32 %v2046_v62  ;;  %v1647_v48 = vmul.f32 %v1609_v20, %v1343_v28 }
 0x207   : > { %v1244_v13 = vadd.f32 %v1243_v7, %v1140_v4  ;;  %v1459_v63 = vmul.f32 %v1421_v3, %v4224_v34 }
 0x208   : > { %v1896_v21 = vmul.f32 0.044715, %v4230_v56  ;;  %v1142_v52 = vpop.f32.mrf.mxu1  ;;  %v2047_v31 = vmul.f32 0.7978846, %v2009_v11 }
 0x209   : > { %v4235_v50 = vadd.f32 %v4048_v46, %v1244_v13  ;;  %v1497_v19 = vadd.f32 %v1459_v63, %v4224_v34  ;;  %v1143_v38 = vadd.f32 %v1142_v52, %v4007_v58  ;;  %v1856_v58 = vmul.f32 0.5, %v4211_v14 }
 0x20a   : > { %3283 = vtanh.f32 %v2047_v31  ;;  %v1934_v5 = vmul.f32 %v1896_v21, %v4230_v56 }
 0x20b   : > { %v3280_v36 = vpop.eup %3279  ;;  %v1384_v6 = vmul.f32 0.044715, %v4235_v50  ;;  %v1535_v55 = vmul.f32 0.7978846, %v1497_v19 }
 0x20c   : > { %v3282_v27 = vpop.eup %3281  ;;  %v1610_v33 = vadd.f32 1.0, %v3280_v36  ;;  %v1972_v35 = vmul.f32 %v1934_v5, %v4230_v56 }
 0x20d   : > { %v1768_v46 = vpop.f32.mrf.mxu3  ;;  %v1422_v15 = vmul.f32 %v1384_v6, %v4235_v50  ;;  %v2122_v45 = vadd.f32 1.0, %v3282_v27  ;;  %3285 = vtanh.f32 %v1535_v55 }
 0x20e   : > { %v4245_v40 = vadd.f32 %v4205_v30, %v1768_v46  ;;  %v1246_v42 = vpop.f32.mrf.mxu2  ;;  %v1648_v26 = vmul.f32 %v1610_v33, %v1344_v32  ;;  %v2010_v49 = vadd.f32 %v1972_v35, %v4230_v56  ;;  %v1345_v46 = vmul.f32 0.5, %v4224_v34 }
 0x20f   : > { %v1247_v41 = vadd.f32 %v1246_v42, %v1143_v38  ;;  %v1460_v23 = vmul.f32 %v1422_v15, %v4235_v50  ;;  %v2160_v47 = vmul.f32 %v2122_v45, %v1856_v58  ;;  %v1346_v15 = vmul.f32 0.5, %v4235_v50 }
 0x210   : > { %v3284_v60 = vpop.eup %3283  ;;  %v1144_v10 = vpop.f32.mrf.mxu1  ;;  %v1675_v12 = vpack.c.bf16 %v1648_v26, %v1647_v48  ;;  %v1897_v39 = vmul.f32 0.044715, %v4245_v40  ;;  %v2048_v59 = vmul.f32 0.7978846, %v2010_v49 }
 0x211   : > { %v4257_v43 = vadd.f32 %v4254_v29, %v1247_v41  ;;  %v2123_v62 = vadd.f32 1.0, %v3284_v60  ;;  %v1498_v0 = vadd.f32 %v1460_v23, %v4235_v50  ;;  %v1145_v7 = vadd.f32 %v1144_v10, %v4015_v1 }
 0x212   : > { %1810 = vmatmul.bf16.gmra.mxu3 %v1675_v12  ;;  %v1935_v2 = vmul.f32 %v1897_v39, %v4245_v40 }
 0x213   : > { %v1385_v14 = vmul.f32 0.044715, %v4257_v43  ;;  %v2161_v4 = vmul.f32 %v2123_v62, %v1857_v61  ;;  %v1536_v17 = vmul.f32 0.7978846, %v1498_v0  ;;  %v3286_v31 = vpop.eup %3285  ;;  %v1859_v0 = vmul.f32 0.5, %v4245_v40 }
 0x214   : > { %v1973_v3 = vmul.f32 %v1935_v2, %v4245_v40  ;;  %v1611_v28 = vadd.f32 1.0, %v3286_v31 }
 0x215   : > { %v1771_v11 = vpop.f32.mrf.mxu3  ;;  %v2198_v22 = vpack.c.bf16 %v2161_v4, %v2160_v47  ;;  %3287 = vtanh.f32 %v1536_v17  ;;  %v1423_v13 = vmul.f32 %v1385_v14, %v4257_v43 }
 0x216   : > { %v4266_v63 = vadd.f32 %v4205_v30, %v1771_v11  ;;  %v1248_v21 = vpop.f32.mrf.mxu2  ;;  %v2011_v52 = vadd.f32 %v1973_v3, %v4245_v40  ;;  %3289 = vtanh.f32 %v2048_v59  ;;  %v1649_v60 = vmul.f32 %v1611_v28, %v1345_v46 }
 0x217   : > { %v1249_v19 = vadd.f32 %v1248_v21, %v1145_v7  ;;  %2289 = vmatmul.bf16.vlgmr.msrb.gmra.mxu0 %v2198_v22  ;;  %v1461_v20 = vmul.f32 %v1423_v13, %v4257_v43 }
 0x218   : > { %v1898_v5 = vmul.f32 0.044715, %v4266_v63  ;;  %v1147_v1 = vpop.f32.mrf.mxu1  ;;  %v2049_v36 = vmul.f32 0.7978846, %v2011_v52 }
 0x219   : > { %v4272_v6 = vadd.f32 %v4254_v29, %v1249_v19  ;;  %v1499_v27 = vadd.f32 %v1461_v20, %v4257_v43  ;;  %v1148_v48 = vadd.f32 %v1147_v1, %v4021_v9  ;;  %v1858_v9 = vmul.f32 0.5, %v4230_v56 }
 0x21a   : > { %3291 = vtanh.f32 %v2049_v36  ;;  %v1936_v32 = vmul.f32 %v1898_v5, %v4266_v63 }
 0x21b   : > { %v3288_v33 = vpop.eup %3287  ;;  %v1386_v35 = vmul.f32 0.044715, %v4272_v6  ;;  %v1537_v41 = vmul.f32 0.7978846, %v1499_v27 }
 0x21c   : > { %v3290_v38 = vpop.eup %3289  ;;  %v1612_v55 = vadd.f32 1.0, %v3288_v33  ;;  %v1974_v42 = vmul.f32 %v1936_v32, %v4266_v63 }
 0x21d   : > { %v1773_v26 = vpop.f32.mrf.mxu3  ;;  %v1424_v49 = vmul.f32 %v1386_v35, %v4272_v6  ;;  %v2124_v58 = vadd.f32 1.0, %v3290_v38  ;;  %3293 = vtanh.f32 %v1537_v41 }
 0x21e   : > { %v4283_v45 = vadd.f32 %v4205_v30, %v1773_v26  ;;  %v1251_v23 = vpop.f32.mrf.mxu2  ;;  %v1650_v10 = vmul.f32 %v1612_v55, %v1346_v15  ;;  %v2012_v12 = vadd.f32 %v1974_v42, %v4266_v63  ;;  %v1347_v42 = vmul.f32 0.5, %v4257_v43 }
 0x21f   : > { %v1252_v34 = vadd.f32 %v1251_v23, %v1148_v48  ;;  %v1462_v50 = vmul.f32 %v1424_v49, %v4272_v6  ;;  %v2162_v7 = vmul.f32 %v2124_v58, %v1858_v9  ;;  %v1348_v48 = vmul.f32 0.5, %v4272_v6 }
 0x220   : > { %v3292_v61 = vpop.eup %3291  ;;  %v1149_v39 = vpop.f32.mrf.mxu1  ;;  %v1676_v62 = vpack.c.bf16 %v1650_v10, %v1649_v60  ;;  %v1899_v2 = vmul.f32 0.044715, %v4283_v45  ;;  %v2050_v17 = vmul.f32 0.7978846, %v2012_v12 }
 0x221   : > { %v4291_v59 = vadd.f32 %v4254_v29, %v1252_v34  ;;  %v2125_v14 = vadd.f32 1.0, %v3292_v61  ;;  %v1500_v47 = vadd.f32 %v1462_v50, %v4272_v6  ;;  %v1150_v22 = vadd.f32 %v1149_v39, %v4029_v16 }
 0x222   : > { %1815 = vmatmul.bf16.gmra.mxu3 %v1676_v62  ;;  %v1937_v4 = vmul.f32 %v1899_v2, %v4283_v45  ;;  %v1861_v2 = vmul.f32 0.5, %v4283_v45 }
 0x223   : > { %v1387_v3 = vmul.f32 0.044715, %v4291_v59  ;;  %v2163_v11 = vmul.f32 %v2125_v14, %v1859_v0  ;;  %v1538_v56 = vmul.f32 0.7978846, %v1500_v47  ;;  %v3294_v5 = vpop.eup %3293 }
 0x224   : > { %v1975_v40 = vmul.f32 %v1937_v4, %v4283_v45  ;;  %v1613_v35 = vadd.f32 1.0, %v3294_v5 }
 0x225   : > { %v1776_v13 = vpop.f32.mrf.mxu3  ;;  %v2199_v21 = vpack.c.bf16 %v2163_v11, %v2162_v7  ;;  %3295 = vtanh.f32 %v1538_v56  ;;  %v1425_v52 = vmul.f32 %v1387_v3, %v4291_v59 }
 0x226   : > { %v4300_v31 = vadd.f32 %v4205_v30, %v1776_v13  ;;  %v1253_v19 = vpop.f32.mrf.mxu2  ;;  %v2013_v20 = vadd.f32 %v1975_v40, %v4283_v45  ;;  %3297 = vtanh.f32 %v2050_v17  ;;  %v1651_v58 = vmul.f32 %v1613_v35, %v1347_v42 }
 0x227   : > { %v1254_v1 = vadd.f32 %v1253_v19, %v1150_v22  ;;  %2294 = vmatmul.bf16.gmra.mxu0 %v2199_v21  ;;  %v1463_v36 = vmul.f32 %v1425_v52, %v4291_v59 }
 0x228   : > { %v1900_v27 = vmul.f32 0.044715, %v4300_v31  ;;  %v1152_v16 = vpop.f32.mrf.mxu1  ;;  %v2051_v28 = vmul.f32 0.7978846, %v2013_v20 }
 0x229   : > { %v4306_v32 = vadd.f32 %v4254_v29, %v1254_v1  ;;  %v1501_v33 = vadd.f32 %v1463_v36, %v4291_v59  ;;  %v1153_v41 = vadd.f32 %v1152_v16, %v4035_v25  ;;  %v1860_v25 = vmul.f32 0.5, %v4266_v63 }
 0x22a   : > { %3299 = vtanh.f32 %v2051_v28  ;;  %v1938_v38 = vmul.f32 %v1900_v27, %v4300_v31 }
 0x22b   : > { %v3296_v46 = vpop.eup %3295  ;;  %v1388_v15 = vmul.f32 0.044715, %v4306_v32  ;;  %v1539_v10 = vmul.f32 0.7978846, %v1501_v33 }
 0x22c   : > { %v3298_v55 = vpop.eup %3297  ;;  %v1614_v26 = vadd.f32 1.0, %v3296_v46  ;;  %v1976_v49 = vmul.f32 %v1938_v38, %v4300_v31 }
 0x22d   : > { %v1778_v23 = vpop.f32.mrf.mxu3  ;;  %v1426_v60 = vmul.f32 %v1388_v15, %v4306_v32  ;;  %v2126_v39 = vadd.f32 1.0, %v3298_v55  ;;  %3301 = vtanh.f32 %v1539_v10 }
 0x22e   : > { %v4317_v12 = vadd.f32 %v4205_v30, %v1778_v23  ;;  %v1256_v34 = vpop.f32.mrf.mxu2  ;;  %v1652_v50 = vmul.f32 %v1614_v26, %v1348_v48  ;;  %v2014_v61 = vadd.f32 %v1976_v49, %v4300_v31  ;;  %v1349_v48 = vmul.f32 0.5, %v4291_v59 }
 0x22f   : > { %v1257_v43 = vadd.f32 %v1256_v34, %v1153_v41  ;;  %v1464_v6 = vmul.f32 %v1426_v60, %v4306_v32  ;;  %v2164_v56 = vmul.f32 %v2126_v39, %v1860_v25  ;;  %v1350_v26 = vmul.f32 0.5, %v4306_v32 }
 0x230   : > { %v3300_v62 = vpop.eup %3299  ;;  %v1154_v9 = vpop.f32.mrf.mxu1  ;;  %v1677_v0 = vpack.c.bf16 %v1652_v50, %v1651_v58  ;;  %v1901_v14 = vmul.f32 0.044715, %v4317_v12  ;;  %v2052_v7 = vmul.f32 0.7978846, %v2014_v61  ;;  %v1863_v25 = vmul.f32 0.5, %v4317_v12 }
 0x231   : > { %v4325_v47 = vadd.f32 %v4254_v29, %v1257_v43  ;;  %v2127_v4 = vadd.f32 1.0, %v3300_v62  ;;  %v1502_v17 = vadd.f32 %v1464_v6, %v4306_v32  ;;  %v1155_v22 = vadd.f32 %v1154_v9, %v4043_v37 }
 0x232   : > { %1820 = vmatmul.bf16.gmra.mxu3 %v1677_v0  ;;  %v1939_v3 = vmul.f32 %v1901_v14, %v4317_v12 }
 0x233   : > { %v1389_v11 = vmul.f32 0.044715, %v4325_v47  ;;  %v2165_v40 = vmul.f32 %v2127_v4, %v1861_v2  ;;  %v1540_v63 = vmul.f32 0.7978846, %v1502_v17  ;;  %v3302_v1 = vpop.eup %3301 }
 0x234   : > { %v1977_v45 = vmul.f32 %v1939_v3, %v4317_v12  ;;  %v1615_v38 = vadd.f32 1.0, %v3302_v1 }
 0x235   : > { %v1781_v13 = vpop.f32.mrf.mxu3  ;;  %v2200_v21 = vpack.c.bf16 %v2165_v40, %v2164_v56  ;;  %3303 = vtanh.f32 %v1540_v63  ;;  %v1427_v52 = vmul.f32 %v1389_v11, %v4325_v47 }
 0x236   : > { %v4334_v19 = vadd.f32 %v4205_v30, %v1781_v13  ;;  %v1258_v20 = vpop.f32.mrf.mxu2  ;;  %v2015_v5 = vadd.f32 %v1977_v45, %v4317_v12  ;;  %3305 = vtanh.f32 %v2052_v7  ;;  %v1653_v61 = vmul.f32 %v1615_v38, %v1349_v48 }
 0x237   : > { %v1259_v36 = vadd.f32 %v1258_v20, %v1155_v22  ;;  %2299 = vmatmul.bf16.gmra.mxu0 %v2200_v21  ;;  %v1465_v27 = vmul.f32 %v1427_v52, %v4325_v47 }
 0x238   : > { %v1902_v16 = vmul.f32 0.044715, %v4334_v19  ;;  %v1157_v37 = vpop.f32.mrf.mxu1  ;;  %v2053_v28 = vmul.f32 0.7978846, %v2015_v5 }
 0x239   : > { %v4340_v33 = vadd.f32 %v4254_v29, %v1259_v36  ;;  %v1503_v35 = vadd.f32 %v1465_v27, %v4325_v47  ;;  %v1158_v23 = vadd.f32 %v1157_v37, %v4118_v53  ;;  %v1862_v53 = vmul.f32 0.5, %v4300_v31 }
 0x23a   : > { %3307 = vtanh.f32 %v2053_v28  ;;  %v1940_v46 = vmul.f32 %v1902_v16, %v4334_v19 }
 0x23b   : > { %v3304_v15 = vpop.eup %3303  ;;  %v1390_v55 = vmul.f32 0.044715, %v4340_v33  ;;  %v1541_v34 = vmul.f32 0.7978846, %v1503_v35  ;;  %v1352_v48 = vmul.f32 0.5, %v4340_v33 }
 0x23c   : > { %v3306_v42 = vpop.eup %3305  ;;  %v1616_v49 = vadd.f32 1.0, %v3304_v15  ;;  %v1978_v41 = vmul.f32 %v1940_v46, %v4334_v19 }
 0x23d   : > { %v1783_v60 = vpop.f32.mrf.mxu3  ;;  %v1428_v10 = vmul.f32 %v1390_v55, %v4340_v33  ;;  %v2128_v6 = vadd.f32 1.0, %v3306_v42  ;;  %3309 = vtanh.f32 %v1541_v34  ;;  %v1351_v42 = vmul.f32 0.5, %v4325_v47 }
 0x23e   : > { %v4351_v58 = vadd.f32 %v4205_v30, %v1783_v60  ;;  %v1261_v50 = vpop.f32.mrf.mxu2  ;;  %v1654_v43 = vmul.f32 %v1616_v49, %v1350_v26  ;;  %v2016_v39 = vadd.f32 %v1978_v41, %v4334_v19 }
 0x23f   : > { %v1262_v59 = vadd.f32 %v1261_v50, %v1158_v23  ;;  %v1466_v32 = vmul.f32 %v1428_v10, %v4340_v33  ;;  %v2166_v56 = vmul.f32 %v2128_v6, %v1862_v53 }
 0x240   : > { %v3308_v62 = vpop.eup %3307  ;;  %v1159_v9 = vpop.f32.mrf.mxu1  ;;  %v1678_v0 = vpack.c.bf16 %v1654_v43, %v1653_v61  ;;  %v1903_v2 = vmul.f32 0.044715, %v4351_v58  ;;  %v2054_v7 = vmul.f32 0.7978846, %v2016_v39 }
 0x241   : > { %v4359_v14 = vadd.f32 %v4254_v29, %v1262_v59  ;;  %v2129_v4 = vadd.f32 1.0, %v3308_v62  ;;  %v1504_v17 = vadd.f32 %v1466_v32, %v4340_v33  ;;  %v1160_v63 = vadd.f32 %v1159_v9, %v4128_v24 }
 0x242   : > { %1825 = vmatmul.bf16.gmra.mxu3 %v1678_v0  ;;  %v1941_v3 = vmul.f32 %v1903_v2, %v4351_v58  ;;  %v1865_v9 = vmul.f32 0.5, %v4351_v58 }
 0x243   : > { %v1391_v11 = vmul.f32 0.044715, %v4359_v14  ;;  %v2167_v40 = vmul.f32 %v2129_v4, %v1863_v25  ;;  %v1542_v31 = vmul.f32 0.7978846, %v1504_v17  ;;  %v3310_v5 = vpop.eup %3309 }
 0x244   : > { %v1979_v12 = vmul.f32 %v1941_v3, %v4351_v58  ;;  %v1617_v35 = vadd.f32 1.0, %v3310_v5 }
 0x245   : > { %v1786_v45 = vpop.f32.mrf.mxu3  ;;  %v2201_v22 = vpack.c.bf16 %v2167_v40, %v2166_v56  ;;  %3311 = vtanh.f32 %v1542_v31  ;;  %v1429_v13 = vmul.f32 %v1391_v11, %v4359_v14 }
 0x246   : > { %v4368_v21 = vadd.f32 %v4205_v30, %v1786_v45  ;;  %v1263_v52 = vpop.f32.mrf.mxu2  ;;  %v2017_v20 = vadd.f32 %v1979_v12, %v4351_v58  ;;  %3313 = vtanh.f32 %v2054_v7  ;;  %v1655_v61 = vmul.f32 %v1617_v35, %v1351_v42 }
 0x247   : > { %v1264_v1 = vadd.f32 %v1263_v52, %v1160_v63  ;;  %2304 = vmatmul.bf16.gmra.mxu0 %v2201_v22  ;;  %v1467_v36 = vmul.f32 %v1429_v13, %v4359_v14 }
 0x248   : > { %v1904_v27 = vmul.f32 0.044715, %v4368_v21  ;;  %v1162_v24 = vpop.f32.mrf.mxu1  ;;  %v2055_v16 = vmul.f32 0.7978846, %v2017_v20 }
 0x249   : > { %v4374_v37 = vadd.f32 %v4254_v29, %v1264_v1  ;;  %v1505_v28 = vadd.f32 %v1467_v36, %v4359_v14  ;;  %v1163_v41 = vadd.f32 %v1162_v24, %v4140_v44  ;;  %v1864_v44 = vmul.f32 0.5, %v4334_v19 }
 0x24a   : > { %3315 = vtanh.f32 %v2055_v16  ;;  %v1942_v38 = vmul.f32 %v1904_v27, %v4368_v21 }
 0x24b   : > { %v3312_v46 = vpop.eup %3311  ;;  %v1392_v15 = vmul.f32 0.044715, %v4374_v37  ;;  %v1543_v10 = vmul.f32 0.7978846, %v1505_v28 }
 0x24c   : > { %v3314_v55 = vpop.eup %3313  ;;  %v1618_v26 = vadd.f32 1.0, %v3312_v46  ;;  %v1980_v49 = vmul.f32 %v1942_v38, %v4368_v21  ;;  %v1353_v46 = vmul.f32 0.5, %v4359_v14 }
 0x24d   : > { %v1788_v23 = vpop.f32.mrf.mxu3  ;;  %v1430_v60 = vmul.f32 %v1392_v15, %v4374_v37  ;;  %v2130_v59 = vadd.f32 1.0, %v3314_v55  ;;  %3317 = vtanh.f32 %v1543_v10  ;;  %v1354_v15 = vmul.f32 0.5, %v4374_v37 }
 0x24e   : > { %v4385_v34 = vadd.f32 %v4205_v30, %v1788_v23  ;;  %v1266_v50 = vpop.f32.mrf.mxu2  ;;  %v1656_v43 = vmul.f32 %v1618_v26, %v1352_v48  ;;  %v2018_v39 = vadd.f32 %v1980_v49, %v4368_v21 }
 0x24f   : > { %v1267_v47 = vadd.f32 %v1266_v50, %v1163_v41  ;;  %v1468_v33 = vmul.f32 %v1430_v60, %v4374_v37  ;;  %v2168_v7 = vmul.f32 %v2130_v59, %v1864_v44 }
 0x250   : > { %v3316_v6 = vpop.eup %3315  ;;  %v1164_v32 = vpop.f32.mrf.mxu1  ;;  %v1679_v62 = vpack.c.bf16 %v1656_v43, %v1655_v61  ;;  %v1905_v0 = vmul.f32 0.044715, %v4385_v34  ;;  %v2056_v17 = vmul.f32 0.7978846, %v2018_v39 }
 0x251   : > { %v4393_v53 = vadd.f32 %v4254_v29, %v1267_v47  ;;  %v2131_v25 = vadd.f32 1.0, %v3316_v6  ;;  %v1506_v2 = vadd.f32 %v1468_v33, %v4374_v37  ;;  %v1165_v56 = vadd.f32 %v1164_v32, %v4153_v51 }
 0x252   : > { %1830 = vmatmul.bf16.gmra.mxu3 %v1679_v62  ;;  %v1943_v4 = vmul.f32 %v1905_v0, %v4385_v34  ;;  %v1867_v33 = vmul.f32 0.5, %v4385_v34 }
 0x253   : > { %v1393_v3 = vmul.f32 0.044715, %v4393_v53  ;;  %v2169_v11 = vmul.f32 %v2131_v25, %v1865_v9  ;;  %v1544_v19 = vmul.f32 0.7978846, %v1506_v2  ;;  %v3318_v13 = vpop.eup %3317 }
 0x254   : > { %v1981_v58 = vmul.f32 %v1943_v4, %v4385_v34  ;;  %v1619_v24 = vadd.f32 1.0, %v3318_v13 }
 0x255   : > { %v1791_v40 = vpop.f32.mrf.mxu3  ;;  %v2202_v31 = vpack.c.bf16 %v2169_v11, %v2168_v7  ;;  %3319 = vtanh.f32 %v1544_v19  ;;  %v1431_v12 = vmul.f32 %v1393_v3, %v4393_v53 }
 0x256   : > { %v4402_v63 = vadd.f32 %v4205_v30, %v1791_v40  ;;  %v1268_v45 = vpop.f32.mrf.mxu2  ;;  %v2019_v22 = vadd.f32 %v1981_v58, %v4385_v34  ;;  %3321 = vtanh.f32 %v2056_v17  ;;  %v1657_v10 = vmul.f32 %v1619_v24, %v1353_v46 }
 0x257   : > { %v1269_v52 = vadd.f32 %v1268_v45, %v1165_v56  ;;  %2309 = vmatmul.bf16.gmra.mxu0 %v2202_v31  ;;  %v1469_v20 = vmul.f32 %v1431_v12, %v4393_v53  ;;  %v1355_v24 = vmul.f32 0.5, %v4393_v53 }
 0x258   : > { %v1906_v5 = vmul.f32 0.044715, %v4402_v63  ;;  %v1167_v51 = vpop.f32.mrf.mxu1  ;;  %v2057_v1 = vmul.f32 0.7978846, %v2019_v22 }
 0x259   : > { %v4408_v36 = vadd.f32 %v4254_v29, %v1269_v52  ;;  %v1507_v27 = vadd.f32 %v1469_v20, %v4393_v53  ;;  %v1168_v48 = vadd.f32 %v1167_v51, %v4161_v8  ;;  %v1866_v8 = vmul.f32 0.5, %v4368_v21 }
 0x25a   : > { %3323 = vtanh.f32 %v2057_v1  ;;  %v1944_v16 = vmul.f32 %v1906_v5, %v4402_v63 }
 0x25b   : > { %v3320_v28 = vpop.eup %3319  ;;  %v1394_v35 = vmul.f32 0.044715, %v4408_v36  ;;  %v1545_v41 = vmul.f32 0.7978846, %v1507_v27 }
 0x25c   : > { %v3322_v38 = vpop.eup %3321  ;;  %v1620_v55 = vadd.f32 1.0, %v3320_v28  ;;  %v1982_v42 = vmul.f32 %v1944_v16, %v4402_v63  ;;  %v1356_v16 = vmul.f32 0.5, %v4408_v36 }
 0x25d   : > { %v1793_v26 = vpop.f32.mrf.mxu3  ;;  %v1432_v49 = vmul.f32 %v1394_v35, %v4408_v36  ;;  %v2132_v43 = vadd.f32 1.0, %v3322_v38  ;;  %3325 = vtanh.f32 %v1545_v41 }
 0x25e   : > { %v4419_v23 = vadd.f32 %v4205_v30, %v1793_v26  ;;  %v1271_v60 = vpop.f32.mrf.mxu2  ;;  %v1658_v50 = vmul.f32 %v1620_v55, %v1354_v15  ;;  %v2020_v61 = vadd.f32 %v1982_v42, %v4402_v63 }
 0x25f   : > { %v1272_v14 = vadd.f32 %v1271_v60, %v1168_v48  ;;  %v1470_v37 = vmul.f32 %v1432_v49, %v4408_v36  ;;  %v2170_v2 = vmul.f32 %v2132_v43, %v1866_v8 }
 0x260   : > { %v3324_v39 = vpop.eup %3323  ;;  %v1169_v47 = vpop.f32.mrf.mxu1  ;;  %v1680_v59 = vpack.c.bf16 %v1658_v50, %v1657_v10  ;;  %v1907_v6 = vmul.f32 0.044715, %v4419_v23  ;;  %v2058_v0 = vmul.f32 0.7978846, %v2020_v61  ;;  %v1868_v61 = vmul.f32 0.5, %v4402_v63 }
 0x261   : > { %v4427_v32 = vadd.f32 %v4254_v29, %v1272_v14  ;;  %v2133_v62 = vadd.f32 1.0, %v3324_v39  ;;  %v1508_v44 = vadd.f32 %v1470_v37, %v4408_v36  ;;  %v1170_v17 = vadd.f32 %v1169_v47, %v4174_v54 }
 0x262   : > { %1835 = vmatmul.bf16.gmra.mxu3 %v1680_v59  ;;  %v1945_v9 = vmul.f32 %v1907_v6, %v4419_v23  ;;  %v1869_v14 = vmul.f32 0.5, %v4419_v23 }
 0x263   : > { %v1395_v25 = vmul.f32 0.044715, %v4427_v32  ;;  %v2171_v4 = vmul.f32 %v2133_v62, %v1867_v33  ;;  %v1546_v21 = vmul.f32 0.7978846, %v1508_v44  ;;  %v3326_v40 = vpop.eup %3325 }
 0x264   : > { %v1983_v34 = vmul.f32 %v1945_v9, %v4419_v23  ;;  %v1621_v5 = vadd.f32 1.0, %v3326_v40 }
 0x265   : > { %v1796_v3 = vpop.f32.mrf.mxu3  ;;  %v2203_v7 = vpack.c.bf16 %v2171_v4, %v2170_v2  ;;  %3327 = vtanh.f32 %v1546_v21  ;;  %v1433_v11 = vmul.f32 %v1395_v25, %v4427_v32 }
 0x266   : > { %v4436_v19 = vadd.f32 %v4205_v30, %v1796_v3  ;;  %v1273_v58 = vpop.f32.mrf.mxu2  ;;  %v2021_v56 = vadd.f32 %v1983_v34, %v4419_v23  ;;  %3329 = vtanh.f32 %v2058_v0  ;;  %v1659_v26 = vmul.f32 %v1621_v5, %v1355_v24 }
 0x267   : > { %v1274_v31 = vadd.f32 %v1273_v58, %v1170_v17  ;;  %2314 = vmatmul.bf16.gmra.mxu0 %v2203_v7  ;;  %v1471_v12 = vmul.f32 %v1433_v11, %v4427_v32 }
 0x268   : > { %v1908_v45 = vmul.f32 0.044715, %v4436_v19  ;;  %v1172_v54 = vpop.f32.mrf.mxu1  ;;  %v2059_v22 = vmul.f32 0.7978846, %v2021_v56 }
 0x269   : > { %v4442_v13 = vadd.f32 %v4254_v29, %v1274_v31  ;;  %v1509_v52 = vadd.f32 %v1471_v12, %v4427_v32  ;;  %v1173_v38 = vadd.f32 %v1172_v54, %v4184_v18  ;;  %v1357_v54 = vmul.f32 0.5, %v4427_v32 }
 0x26a   : > { %v1946_v20 = vmul.f32 %v1908_v45, %v4436_v19  ;;  %3331 = vtanh.f32 %v2059_v22  ;;  %v1870_v32 = vmul.f32 0.5, %v4436_v19 }
 0x26b   : > { %v3328_v51 = vpop.eup %3327  ;;  %v1396_v1 = vmul.f32 0.044715, %v4442_v13  ;;  %v1547_v55 = vmul.f32 0.7978846, %v1509_v52  ;;  %v1358_v22 = vmul.f32 0.5, %v4442_v13 }
 0x26c   : > { %v3330_v27 = vpop.eup %3329  ;;  %v1622_v28 = vadd.f32 1.0, %v3328_v51  ;;  %v1984_v35 = vmul.f32 %v1946_v20, %v4436_v19 }
 0x26d   : > { %v1798_v46 = vpop.f32.mrf.mxu3  ;;  %v1434_v15 = vmul.f32 %v1396_v1, %v4442_v13  ;;  %v2134_v60 = vadd.f32 1.0, %v3330_v27  ;;  %3333 = vtanh.f32 %v1547_v55 }
 0x26e   : > { %v4453_v42 = vadd.f32 %v4205_v30, %v1798_v46  ;;  %v1276_v48 = vpop.f32.mrf.mxu2  ;;  %v1660_v49 = vmul.f32 %v1622_v28, %v1356_v16  ;;  %v2022_v41 = vadd.f32 %v1984_v35, %v4436_v19 }
 0x26f   : > { %v1277_v53 = vadd.f32 %v1276_v48, %v1173_v38  ;;  %v1472_v36 = vmul.f32 %v1434_v15, %v4442_v13  ;;  %v2172_v6 = vmul.f32 %v2134_v60, %v1868_v61 }
 0x270   : > { %v3332_v10 = vpop.eup %3331  ;;  %v1909_v50 = vmul.f32 0.044715, %v4453_v42  ;;  %v1681_v18 = vpack.c.bf16 %v1660_v49, %v1659_v26  ;;  %v1174_v59 = vpop.f32.mrf.mxu1  ;;  %v2060_v8 = vmul.f32 0.7978846, %v2022_v41 }
 0x271   : > { %v4461_v43 = vadd.f32 %v4254_v29, %v1277_v53  ;;  %v2135_v37 = vadd.f32 1.0, %v3332_v10  ;;  %v1510_v39 = vadd.f32 %v1472_v36, %v4442_v13  ;;  %v1175_v23 = vadd.f32 %v1174_v59, %v4196_v57 }
 0x272   : > { %v1947_v47 = vmul.f32 %v1909_v50, %v4453_v42  ;;  %1840 = vmatmul.bf16.gmra.mxu3 %v1681_v18  ;;  %v1871_v13 = vmul.f32 0.5, %v4453_v42 }
 0x273   : > { %v1397_v33 = vmul.f32 0.044715, %v4461_v43  ;;  %v2173_v62 = vmul.f32 %v2135_v37, %v1869_v14  ;;  %v1548_v44 = vmul.f32 0.7978846, %v1510_v39  ;;  %v3334_v34 = vpop.eup %3333 }
 0x274   : > { %v1985_v63 = vmul.f32 %v1947_v47, %v4453_v42  ;;  %v1623_v40 = vadd.f32 1.0, %v3334_v34 }
 0x275   : > { %v1801_v9 = vpop.f32.mrf.mxu3  ;;  %v2204_v0 = vpack.c.bf16 %v2173_v62, %v2172_v6  ;;  %3335 = vtanh.f32 %v1548_v44  ;;  %v1435_v25 = vmul.f32 %v1397_v33, %v4461_v43  ;;  %v4495_v44 = vld [vmem:[%s4731_s6] ss:$0 sm:$0xff] }
 0x276   : > { %v4470_v2 = vadd.f32 %v4205_v30, %v1801_v9  ;;  %v1278_v4 = vpop.f32.mrf.mxu2  ;;  %v2023_v21 = vadd.f32 %v1985_v63, %v4453_v42  ;;  %3337 = vtanh.f32 %v2060_v8  ;;  %v1661_v27 = vmul.f32 %v1623_v40, %v1357_v54 }
 0x277   : > { %v1279_v17 = vadd.f32 %v1278_v4, %v1175_v23  ;;  %2319 = vmatmul.bf16.gmra.mxu0 %v2204_v0  ;;  %v1473_v3 = vmul.f32 %v1435_v25, %v4461_v43  ;;  %v1359_v8 = vmul.f32 0.5, %v4461_v43 }
 0x278   : > { %v1910_v7 = vmul.f32 0.044715, %v4470_v2  ;;  %v2061_v57 = vmul.f32 0.7978846, %v2023_v21  ;;  %v1872_v34 = vmul.f32 0.5, %v4470_v2 }
 0x279   : > { %v1322_v11 = vadd.f32 %v4254_v29, %v1279_v17  ;;  %v1511_v58 = vadd.f32 %v1473_v3, %v4461_v43 }
 0x27a   : > { %v1948_v56 = vmul.f32 %v1910_v7, %v4470_v2  ;;  %3339 = vtanh.f32 %v2061_v57 }
 0x27b   : > { %v3336_v31 = vpop.eup %3335  ;;  %v1398_v12 = vmul.f32 0.044715, %v1322_v11  ;;  %v1549_v1 = vmul.f32 0.7978846, %v1511_v58  ;;  %v1360_v33 = vmul.f32 0.5, %v1322_v11 }
 0x27c   : > { %v3338_v45 = vpop.eup %3337  ;;  %v1624_v52 = vadd.f32 1.0, %v3336_v31  ;;  %v1986_v20 = vmul.f32 %v1948_v56, %v4470_v2 }
 0x27d   : > { %v1803_v5 = vpop.f32.mrf.mxu3  ;;  %v1436_v51 = vmul.f32 %v1398_v12, %v1322_v11  ;;  %v2136_v28 = vadd.f32 1.0, %v3338_v45  ;;  %3341 = vtanh.f32 %v1549_v1  ;;  %v3391_v12 = vld [vmem:[%s3913_s23] sm:$0xff] }
 0x27e   : > { %v1804_v29 = vadd.f32 %v4205_v30, %v1803_v5  ;;  %v1662_v24 = vmul.f32 %v1624_v52, %v1358_v22  ;;  %v2024_v16 = vadd.f32 %v1986_v20, %v4470_v2  ;;  %v4509_v2 = vld [vmem:[%s4734_s9] ss:$0 sm:$0xff] }
 0x27f   : > { %v1474_v35 = vmul.f32 %v1436_v51, %v1322_v11  ;;  %v2174_v41 = vmul.f32 %v2136_v28, %v1870_v32 }
 0x280   : > { %v3340_v38 = vpop.eup %3339  ;;  %v1911_v46 = vmul.f32 0.044715, %v1804_v29  ;;  %v1682_v15 = vpack.c.bf16 %v1662_v24, %v1661_v27  ;;  %v2062_v49 = vmul.f32 0.7978846, %v2024_v16  ;;  %v1873_v17 = vmul.f32 0.5, %v1804_v29 }
 0x281   : > { %v2137_v55 = vadd.f32 1.0, %v3340_v38  ;;  %v1512_v48 = vadd.f32 %v1474_v35, %v1322_v11  ;;  %v4503_v11 = vld [vmem:[%s4733_s8] ss:$0 sm:$0xff]  ;;  %v3392_v35 = vld [vmem:[%s3913_s23 + $0x8] sm:$0xff] }
 0x282   : > { %v1949_v26 = vmul.f32 %v1911_v46, %v1804_v29  ;;  %1845 = vmatmul.bf16.gmra.mxu3 %v1682_v15 }
 0x283   : > { %v2175_v53 = vmul.f32 %v2137_v55, %v1871_v13  ;;  %v1550_v60 = vmul.f32 0.7978846, %v1512_v48  ;;  %v3342_v19 = vpop.eup %3341 }
 0x284   : > { %v1987_v36 = vmul.f32 %v1949_v26, %v1804_v29  ;;  %v1625_v39 = vadd.f32 1.0, %v3342_v19 }
 0x285   : > { %v1806_v10 = vpop.f32.mrf.mxu3  ;;  %v2205_v50 = vpack.c.bf16 %v2175_v53, %v2174_v41  ;;  %3343 = vtanh.f32 %v1550_v60 }
 0x286   : > { %v4486_v18 = vadd.f32 %v4205_v30, %v1806_v10  ;;  %v2025_v61 = vadd.f32 %v1987_v36, %v1804_v29  ;;  %3345 = vtanh.f32 %v2062_v49  ;;  %v1663_v23 = vmul.f32 %v1625_v39, %v1359_v8 }
 0x287   : > { %2324 = vmatmul.bf16.gmra.mxu0 %v2205_v50 }
 0x288   : > { %v1912_v42 = vmul.f32 0.044715, %v4486_v18  ;;  %v2063_v14 = vmul.f32 0.7978846, %v2025_v61  ;;  %v1874_v41 = vmul.f32 0.5, %v4486_v18 }
 0x28a   : > { %v1950_v37 = vmul.f32 %v1912_v42, %v4486_v18  ;;  %3347 = vtanh.f32 %v2063_v14  ;;  %v3393_v14 = vld [vmem:[%s3913_s23 + $0x10] sm:$0xff] }
 0x28b   : > { %v3344_v47 = vpop.eup %3343 }
 0x28c   : > { %v3346_v59 = vpop.eup %3345  ;;  %v1626_v6 = vadd.f32 1.0, %v3344_v47  ;;  %v1988_v30 = vmul.f32 %v1950_v37, %v4486_v18 }
 0x28d   : > { %v1808_v62 = vpop.f32.mrf.mxu3  ;;  %v2138_v25 = vadd.f32 1.0, %v3346_v59 }
 0x28e   : > { %v1809_v63 = vadd.f32 %v4495_v44, %v1808_v62  ;;  %v1664_v9 = vmul.f32 %v1626_v6, %v1360_v33  ;;  %v2026_v0 = vadd.f32 %v1988_v30, %v4486_v18 }
 0x28f   : > { %v2176_v58 = vmul.f32 %v2138_v25, %v1872_v34 }
 0x290   : > { %v3348_v4 = vpop.eup %3347  ;;  %v1913_v43 = vmul.f32 0.044715, %v1809_v63  ;;  %v1683_v21 = vpack.c.bf16 %v1664_v9, %v1663_v23  ;;  %v2064_v57 = vmul.f32 0.7978846, %v2026_v0  ;;  %v1875_v53 = vmul.f32 0.5, %v1809_v63  ;;  %v3394_v0 = vld [vmem:[%s3913_s23 + $0x18] sm:$0xff] }
 0x291   : > { %v2139_v3 = vadd.f32 1.0, %v3348_v4 }
 0x292   : > { %v1951_v7 = vmul.f32 %v1913_v43, %v1809_v63  ;;  %1850 = vmatmul.bf16.gmra.mxu3 %v1683_v21  ;;  %3349 = vtanh.f32 %v2064_v57 }
 0x293   : > { %v2177_v56 = vmul.f32 %v2139_v3, %v1873_v17 }
 0x294   : > { %v2290_v40 = vpop.f32.mrf.mxu0  ;;  %v1989_v31 = vmul.f32 %v1951_v7, %v1809_v63 }
 0x295   : > { %v2385_v45 = vadd.f32 %v3391_v12, %v2290_v40  ;;  %v1811_v54 = vpop.f32.mrf.mxu3  ;;  %v2206_v22 = vpack.c.bf16 %v2177_v56, %v2176_v58 }
 0x296   : > { %v4512_v52 = vadd.f32 %v4495_v44, %v1811_v54  ;;  %v2027_v20 = vadd.f32 %v1989_v31, %v1809_v63 }
 0x297   : > { %v2427_v5 = vmul.f32 %v4503_v11, %v2385_v45  ;;  %2329 = vmatmul.bf16.gmra.mxu0 %v2206_v22 }
 0x298   : > { %v1914_v51 = vmul.f32 0.044715, %v4512_v52  ;;  %v2065_v1 = vmul.f32 0.7978846, %v2027_v20  ;;  %v3350_v24 = vpop.eup %3349  ;;  %v1876_v58 = vmul.f32 0.5, %v4512_v52 }
 0x299   : > { %v2469_v29 = vadd.f32 %v4509_v2, %v2427_v5  ;;  %v2140_v55 = vadd.f32 1.0, %v3350_v24  ;;  %v3395_v5 = vld [vmem:[%s3913_s23 + $0x20] sm:$0xff] }
 0x29a   : > { %v1952_v27 = vmul.f32 %v1914_v51, %v4512_v52  ;;  %3351 = vtanh.f32 %v2065_v1 }
 0x29b   : > { %2507 = vst [vmem:[%s4519_s30] sm:$0xff] %v2469_v29  ;;  %v2178_v50 = vmul.f32 %v2140_v55, %v1874_v41 }
 0x29c   : > { %v2292_v16 = vpop.f32.mrf.mxu0  ;;  %v1990_v28 = vmul.f32 %v1952_v27, %v4512_v52 }
 0x29d   : > { %v2386_v38 = vadd.f32 %v3392_v35, %v2292_v16  ;;  %v1813_v46 = vpop.f32.mrf.mxu3 }
 0x29e   : > { %v1814_v15 = vadd.f32 %v4495_v44, %v1813_v46  ;;  %v2028_v32 = vadd.f32 %v1990_v28, %v4512_v52 }
 0x29f   : > { %v2428_v13 = vmul.f32 %v4503_v11, %v2386_v38 }
 0x2a0   : > { %v3352_v48 = vpop.eup %3351  ;;  %v1915_v26 = vmul.f32 0.044715, %v1814_v15  ;;  %v2066_v10 = vmul.f32 0.7978846, %v2028_v32  ;;  %v1877_v56 = vmul.f32 0.5, %v1814_v15 }
 0x2a1   : > { %v2470_v49 = vadd.f32 %v4509_v2, %v2428_v13  ;;  %v2141_v60 = vadd.f32 1.0, %v3352_v48  ;;  %v3396_v13 = vld [vmem:[%s3913_s23 + $0x28] sm:$0xff] }
 0x2a2   : > { %v1953_v36 = vmul.f32 %v1915_v26, %v1814_v15  ;;  %3353 = vtanh.f32 %v2066_v10 }
 0x2a3   : > { %2508 = vst [vmem:[%s4519_s30 + $0x8] sm:$0xff] %v2470_v49  ;;  %v2179_v61 = vmul.f32 %v2141_v60, %v1875_v53 }
 0x2a4   : > { %v2295_v19 = vpop.f32.mrf.mxu0  ;;  %v1991_v42 = vmul.f32 %v1953_v36, %v1814_v15 }
 0x2a5   : > { %v2387_v37 = vadd.f32 %v3393_v14, %v2295_v19  ;;  %v1816_v39 = vpop.f32.mrf.mxu3  ;;  %v2207_v47 = vpack.c.bf16 %v2179_v61, %v2178_v50 }
 0x2a6   : > { %v1817_v59 = vadd.f32 %v4495_v44, %v1816_v39  ;;  %v2029_v8 = vadd.f32 %v1991_v42, %v1814_v15 }
 0x2a7   : > { %v2429_v18 = vmul.f32 %v4503_v11, %v2387_v37  ;;  %2334 = vmatmul.bf16.gmra.mxu0 %v2207_v47 }
 0x2a8   : > { %v1916_v33 = vmul.f32 0.044715, %v1817_v59  ;;  %v2067_v6 = vmul.f32 0.7978846, %v2029_v8  ;;  %v3354_v63 = vpop.eup %3353  ;;  %v1878_v50 = vmul.f32 0.5, %v1817_v59 }
 0x2a9   : > { %v2471_v30 = vadd.f32 %v4509_v2, %v2429_v18  ;;  %v2142_v17 = vadd.f32 1.0, %v3354_v63  ;;  %v3397_v18 = vld [vmem:[%s3913_s23 + $0x30] sm:$0xff] }
 0x2aa   : > { %v1954_v62 = vmul.f32 %v1916_v33, %v1817_v59  ;;  %3355 = vtanh.f32 %v2067_v6 }
 0x2ab   : > { %2509 = vst [vmem:[%s4519_s30 + $0x10] sm:$0xff] %v2471_v30  ;;  %v2180_v45 = vmul.f32 %v2142_v17, %v1876_v58 }
 0x2ac   : > { %v2297_v23 = vpop.f32.mrf.mxu0  ;;  %v1992_v9 = vmul.f32 %v1954_v62, %v1817_v59 }
 0x2ad   : > { %v2388_v25 = vadd.f32 %v3394_v0, %v2297_v23  ;;  %v1818_v4 = vpop.f32.mrf.mxu3 }
 0x2ae   : > { %v1819_v43 = vadd.f32 %v4495_v44, %v1818_v4  ;;  %v2030_v21 = vadd.f32 %v1992_v9, %v1817_v59 }
 0x2af   : > { %v2430_v34 = vmul.f32 %v4503_v11, %v2388_v25 }
 0x2b0   : > { %v3356_v3 = vpop.eup %3355  ;;  %v1917_v7 = vmul.f32 0.044715, %v1819_v43  ;;  %v2068_v12 = vmul.f32 0.7978846, %v2030_v21  ;;  %v1879_v61 = vmul.f32 0.5, %v1819_v43 }
 0x2b1   : > { %v2472_v57 = vadd.f32 %v4509_v2, %v2430_v34  ;;  %v2143_v40 = vadd.f32 1.0, %v3356_v3  ;;  %v3398_v34 = vld [vmem:[%s3913_s23 + $0x38] sm:$0xff] }
 0x2b2   : > { %v1955_v31 = vmul.f32 %v1917_v7, %v1819_v43  ;;  %3357 = vtanh.f32 %v2068_v12 }
 0x2b3   : > { %2510 = vst [vmem:[%s4519_s30 + $0x18] sm:$0xff] %v2472_v57  ;;  %v2181_v54 = vmul.f32 %v2143_v40, %v1877_v56 }
 0x2b4   : > { %v2300_v22 = vpop.f32.mrf.mxu0  ;;  %v1993_v20 = vmul.f32 %v1955_v31, %v1819_v43 }
 0x2b5   : > { %v2389_v51 = vadd.f32 %v3395_v5, %v2300_v22  ;;  %v1821_v1 = vpop.f32.mrf.mxu3  ;;  %v2208_v29 = vpack.c.bf16 %v2181_v54, %v2180_v45 }
 0x2b6   : > { %v1822_v27 = vadd.f32 %v4495_v44, %v1821_v1  ;;  %v2031_v24 = vadd.f32 %v1993_v20, %v1819_v43 }
 0x2b7   : > { %v2431_v52 = vmul.f32 %v4503_v11, %v2389_v51  ;;  %2339 = vmatmul.bf16.gmra.mxu0 %v2208_v29 }
 0x2b8   : > { %v1918_v16 = vmul.f32 0.044715, %v1822_v27  ;;  %v2069_v28 = vmul.f32 0.7978846, %v2031_v24  ;;  %v3358_v46 = vpop.eup %3357  ;;  %v1880_v45 = vmul.f32 0.5, %v1822_v27 }
 0x2b9   : > { %v2473_v35 = vadd.f32 %v4509_v2, %v2431_v52  ;;  %v2144_v53 = vadd.f32 1.0, %v3358_v46  ;;  %v3399_v52 = vld [vmem:[%s3913_s23 + $0x40] sm:$0xff] }
 0x2ba   : > { %v1956_v38 = vmul.f32 %v1918_v16, %v1822_v27  ;;  %3359 = vtanh.f32 %v2069_v28 }
 0x2bb   : > { %2511 = vst [vmem:[%s4519_s30 + $0x20] sm:$0xff] %v2473_v35  ;;  %v2182_v37 = vmul.f32 %v2144_v53, %v1878_v50 }
 0x2bc   : > { %v2302_v15 = vpop.f32.mrf.mxu0  ;;  %v1994_v32 = vmul.f32 %v1956_v38, %v1822_v27 }
 0x2bd   : > { %v2390_v55 = vadd.f32 %v3396_v13, %v2302_v15  ;;  %v1823_v48 = vpop.f32.mrf.mxu3 }
 0x2be   : > { %v1824_v26 = vadd.f32 %v4495_v44, %v1823_v48  ;;  %v2032_v49 = vadd.f32 %v1994_v32, %v1822_v27 }
 0x2bf   : > { %v2432_v41 = vmul.f32 %v4503_v11, %v2390_v55 }
 0x2c0   : > { %v3360_v60 = vpop.eup %3359  ;;  %v1919_v36 = vmul.f32 0.044715, %v1824_v26  ;;  %v2070_v14 = vmul.f32 0.7978846, %v2032_v49  ;;  %v1881_v54 = vmul.f32 0.5, %v1824_v26 }
 0x2c1   : > { %v2474_v10 = vadd.f32 %v4509_v2, %v2432_v41  ;;  %v2145_v19 = vadd.f32 1.0, %v3360_v60  ;;  %v3400_v41 = vld [vmem:[%s3913_s23 + $0x48] sm:$0xff] }
 0x2c2   : > { %v1957_v42 = vmul.f32 %v1919_v36, %v1824_v26  ;;  %3361 = vtanh.f32 %v2070_v14 }
 0x2c3   : > { %2512 = vst [vmem:[%s4519_s30 + $0x28] sm:$0xff] %v2474_v10  ;;  %v2183_v39 = vmul.f32 %v2145_v19, %v1879_v61 }
 0x2c4   : > { %v2305_v47 = vpop.f32.mrf.mxu0  ;;  %v1995_v8 = vmul.f32 %v1957_v42, %v1824_v26 }
 0x2c5   : > { %v2391_v33 = vadd.f32 %v3397_v18, %v2305_v47  ;;  %v1826_v6 = vpop.f32.mrf.mxu3  ;;  %v2209_v30 = vpack.c.bf16 %v2183_v39, %v2182_v37 }
 0x2c6   : > { %v1827_v62 = vadd.f32 %v4495_v44, %v1826_v6  ;;  %v2033_v63 = vadd.f32 %v1995_v8, %v1824_v26 }
 0x2c7   : > { %v2433_v59 = vmul.f32 %v4503_v11, %v2391_v33  ;;  %2344 = vmatmul.bf16.gmra.mxu0 %v2209_v30 }
 0x2c8   : > { %v1920_v23 = vmul.f32 0.044715, %v1827_v62  ;;  %v2071_v9 = vmul.f32 0.7978846, %v2033_v63  ;;  %v3362_v4 = vpop.eup %3361  ;;  %v1882_v37 = vmul.f32 0.5, %v1827_v62 }
 0x2c9   : > { %v2475_v0 = vadd.f32 %v4509_v2, %v2433_v59  ;;  %v2146_v56 = vadd.f32 1.0, %v3362_v4  ;;  %v3401_v59 = vld [vmem:[%s3913_s23 + $0x50] sm:$0xff] }
 0x2ca   : > { %v1958_v25 = vmul.f32 %v1920_v23, %v1827_v62  ;;  %3363 = vtanh.f32 %v2071_v9 }
 0x2cb   : > { %2513 = vst [vmem:[%s4519_s30 + $0x30] sm:$0xff] %v2475_v0  ;;  %v2184_v51 = vmul.f32 %v2146_v56, %v1880_v45 }
 0x2cc   : > { %v2307_v43 = vpop.f32.mrf.mxu0  ;;  %v1996_v21 = vmul.f32 %v1958_v25, %v1827_v62 }
 0x2cd   : > { %v2392_v17 = vadd.f32 %v3398_v34, %v2307_v43  ;;  %v1828_v3 = vpop.f32.mrf.mxu3 }
 0x2ce   : > { %v1829_v7 = vadd.f32 %v4495_v44, %v1828_v3  ;;  %v2034_v57 = vadd.f32 %v1996_v21, %v1827_v62 }
 0x2cf   : > { %v2434_v58 = vmul.f32 %v4503_v11, %v2392_v17 }
 0x2d0   : > { %v3364_v40 = vpop.eup %3363  ;;  %v1921_v31 = vmul.f32 0.044715, %v1829_v7  ;;  %v2072_v5 = vmul.f32 0.7978846, %v2034_v57  ;;  %v1883_v39 = vmul.f32 0.5, %v1829_v7 }
 0x2d1   : > { %v2476_v12 = vadd.f32 %v4509_v2, %v2434_v58  ;;  %v2147_v22 = vadd.f32 1.0, %v3364_v40  ;;  %v3402_v58 = vld [vmem:[%s3913_s23 + $0x58] sm:$0xff] }
 0x2d2   : > { %v1959_v20 = vmul.f32 %v1921_v31, %v1829_v7  ;;  %3365 = vtanh.f32 %v2072_v5 }
 0x2d3   : > { %2514 = vst [vmem:[%s4519_s30 + $0x38] sm:$0xff] %v2476_v12  ;;  %v2185_v1 = vmul.f32 %v2147_v22, %v1881_v54 }
 0x2d4   : > { %v2310_v29 = vpop.f32.mrf.mxu0  ;;  %v1997_v24 = vmul.f32 %v1959_v20, %v1829_v7 }
 0x2d5   : > { %v2393_v16 = vadd.f32 %v3399_v52, %v2310_v29  ;;  %v1831_v28 = vpop.f32.mrf.mxu3  ;;  %v2210_v35 = vpack.c.bf16 %v2185_v1, %v2184_v51 }
 0x2d6   : > { %v1832_v38 = vadd.f32 %v4495_v44, %v1831_v28  ;;  %v2035_v46 = vadd.f32 %v1997_v24, %v1829_v7 }
 0x2d7   : > { %v2435_v27 = vmul.f32 %v4503_v11, %v2393_v16  ;;  %2349 = vmatmul.bf16.gmra.mxu0 %v2210_v35 }
 0x2d8   : > { %v1922_v15 = vmul.f32 0.044715, %v1832_v38  ;;  %v2073_v32 = vmul.f32 0.7978846, %v2035_v46  ;;  %v3366_v48 = vpop.eup %3365  ;;  %v1884_v51 = vmul.f32 0.5, %v1832_v38 }
 0x2d9   : > { %v2477_v13 = vadd.f32 %v4509_v2, %v2435_v27  ;;  %v2148_v61 = vadd.f32 1.0, %v3366_v48  ;;  %v3403_v27 = vld [vmem:[%s3913_s23 + $0x60] sm:$0xff] }
 0x2da   : > { %v1960_v55 = vmul.f32 %v1922_v15, %v1832_v38  ;;  %3367 = vtanh.f32 %v2073_v32 }
 0x2db   : > { %2515 = vst [vmem:[%s4519_s30 + $0x40] sm:$0xff] %v2477_v13  ;;  %v2186_v33 = vmul.f32 %v2148_v61, %v1882_v37 }
 0x2dc   : > { %v2312_v26 = vpop.f32.mrf.mxu0  ;;  %v1998_v49 = vmul.f32 %v1960_v55, %v1832_v38 }
 0x2dd   : > { %v2394_v53 = vadd.f32 %v3400_v41, %v2312_v26  ;;  %v1833_v60 = vpop.f32.mrf.mxu3 }
 0x2de   : > { %v1834_v36 = vadd.f32 %v4495_v44, %v1833_v60  ;;  %v2036_v10 = vadd.f32 %v1998_v49, %v1832_v38 }
 0x2df   : > { %v2436_v50 = vmul.f32 %v4503_v11, %v2394_v53 }
 0x2e0   : > { %v3368_v19 = vpop.eup %3367  ;;  %v1923_v42 = vmul.f32 0.044715, %v1834_v36  ;;  %v2074_v18 = vmul.f32 0.7978846, %v2036_v10  ;;  %v1885_v1 = vmul.f32 0.5, %v1834_v36 }
 0x2e1   : > { %v2478_v14 = vadd.f32 %v4509_v2, %v2436_v50  ;;  %v2149_v47 = vadd.f32 1.0, %v3368_v19  ;;  %v3404_v50 = vld [vmem:[%s3913_s23 + $0x68] sm:$0xff] }
 0x2e2   : > { %v1961_v8 = vmul.f32 %v1923_v42, %v1834_v36  ;;  %3369 = vtanh.f32 %v2074_v18 }
 0x2e3   : > { %2516 = vst [vmem:[%s4519_s30 + $0x48] sm:$0xff] %v2478_v14  ;;  %v2187_v6 = vmul.f32 %v2149_v47, %v1883_v39 }
 0x2e4   : > { %v2315_v30 = vpop.f32.mrf.mxu0  ;;  %v1999_v63 = vmul.f32 %v1961_v8, %v1834_v36 }
 0x2e5   : > { %v2395_v23 = vadd.f32 %v3401_v59, %v2315_v30  ;;  %v1836_v9 = vpop.f32.mrf.mxu3  ;;  %v2211_v0 = vpack.c.bf16 %v2187_v6, %v2186_v33 }
 0x2e6   : > { %v1837_v25 = vadd.f32 %v4495_v44, %v1836_v9  ;;  %v2037_v4 = vadd.f32 %v1999_v63, %v1834_v36 }
 0x2e7   : > { %v2437_v62 = vmul.f32 %v4503_v11, %v2395_v23  ;;  %2354 = vmatmul.bf16.gmra.mxu0 %v2211_v0 }
 0x2e8   : > { %v1924_v43 = vmul.f32 0.044715, %v1837_v25  ;;  %v2075_v21 = vmul.f32 0.7978846, %v2037_v4  ;;  %v3370_v3 = vpop.eup %3369  ;;  %v1886_v33 = vmul.f32 0.5, %v1837_v25 }
 0x2e9   : > { %v2479_v34 = vadd.f32 %v4509_v2, %v2437_v62  ;;  %v2150_v54 = vadd.f32 1.0, %v3370_v3  ;;  %v3405_v62 = vld [vmem:[%s3913_s23 + $0x70] sm:$0xff] }
 0x2ea   : > { %v1962_v17 = vmul.f32 %v1924_v43, %v1837_v25  ;;  %3371 = vtanh.f32 %v2075_v21 }
 0x2eb   : > { %2517 = vst [vmem:[%s4519_s30 + $0x50] sm:$0xff] %v2479_v34  ;;  %v2188_v16 = vmul.f32 %v2150_v54, %v1884_v51 }
 0x2ec   : > { %v2317_v7 = vpop.f32.mrf.mxu0  ;;  %v2000_v57 = vmul.f32 %v1962_v17, %v1837_v25 }
 0x2ed   : > { %v2396_v56 = vadd.f32 %v3402_v58, %v2317_v7  ;;  %v1838_v40 = vpop.f32.mrf.mxu3 }
 0x2ee   : > { %v1839_v31 = vadd.f32 %v4495_v44, %v1838_v40  ;;  %v2038_v12 = vadd.f32 %v2000_v57, %v1837_v25 }
 0x2ef   : > { %v2438_v45 = vmul.f32 %v4503_v11, %v2396_v56 }
 0x2f0   : > { %v3372_v22 = vpop.eup %3371  ;;  %v1925_v20 = vmul.f32 0.044715, %v1839_v31  ;;  %v2076_v52 = vmul.f32 0.7978846, %v2038_v12  ;;  %v1887_v6 = vmul.f32 0.5, %v1839_v31 }
 0x2f1   : > { %v2480_v5 = vadd.f32 %v4509_v2, %v2438_v45  ;;  %v2151_v29 = vadd.f32 1.0, %v3372_v22  ;;  %v3406_v45 = vld [vmem:[%s3913_s23 + $0x78] sm:$0xff] }
 0x2f2   : > { %v1963_v24 = vmul.f32 %v1925_v20, %v1839_v31  ;;  %3373 = vtanh.f32 %v2076_v52 }
 0x2f3   : > { %2518 = vst [vmem:[%s4519_s30 + $0x58] sm:$0xff] %v2480_v5  ;;  %v2189_v28 = vmul.f32 %v2151_v29, %v1885_v1 }
 0x2f4   : > { %v2320_v35 = vpop.f32.mrf.mxu0  ;;  %v2001_v46 = vmul.f32 %v1963_v24, %v1839_v31 }
 0x2f5   : > { %v2397_v15 = vadd.f32 %v3403_v27, %v2320_v35  ;;  %v1841_v32 = vpop.f32.mrf.mxu3  ;;  %v2212_v13 = vpack.c.bf16 %v2189_v28, %v2188_v16 }
 0x2f6   : > { %v1842_v55 = vadd.f32 %v4495_v44, %v1841_v32  ;;  %v2039_v48 = vadd.f32 %v2001_v46, %v1839_v31 }
 0x2f7   : > { %v2439_v38 = vmul.f32 %v4503_v11, %v2397_v15  ;;  %2359 = vmatmul.bf16.gmra.mxu0 %v2212_v13 }
 0x2f8   : > { %v1926_v26 = vmul.f32 0.044715, %v1842_v55  ;;  %v2077_v49 = vmul.f32 0.7978846, %v2039_v48  ;;  %v3374_v60 = vpop.eup %3373  ;;  %v1888_v16 = vmul.f32 0.5, %v1842_v55 }
 0x2f9   : > { %v2481_v41 = vadd.f32 %v4509_v2, %v2439_v38  ;;  %v2152_v39 = vadd.f32 1.0, %v3374_v60  ;;  %v3407_v38 = vld [vmem:[%s3913_s23 + $0x80] sm:$0xff] }
 0x2fa   : > { %v1964_v53 = vmul.f32 %v1926_v26, %v1842_v55  ;;  %3375 = vtanh.f32 %v2077_v49 }
 0x2fb   : > { %2519 = vst [vmem:[%s4519_s30 + $0x60] sm:$0xff] %v2481_v41  ;;  %v2190_v23 = vmul.f32 %v2152_v39, %v1886_v33 }
 0x2fc   : > { %v2322_v36 = vpop.f32.mrf.mxu0  ;;  %v2002_v10 = vmul.f32 %v1964_v53, %v1842_v55 }
 0x2fd   : > { %v2398_v61 = vadd.f32 %v3404_v50, %v2322_v36  ;;  %v1843_v19 = vpop.f32.mrf.mxu3 }
 0x2fe   : > { %v1844_v42 = vadd.f32 %v4495_v44, %v1843_v19  ;;  %v2040_v14 = vadd.f32 %v2002_v10, %v1842_v55 }
 0x2ff   : > { %v2440_v37 = vmul.f32 %v4503_v11, %v2398_v61 }
 0x300   : > { %v3376_v47 = vpop.eup %3375  ;;  %v1927_v8 = vmul.f32 0.044715, %v1844_v42  ;;  %v2078_v59 = vmul.f32 0.7978846, %v2040_v14  ;;  %v1889_v28 = vmul.f32 0.5, %v1844_v42 }
 0x301   : > { %v2482_v18 = vadd.f32 %v4509_v2, %v2440_v37  ;;  %v2153_v30 = vadd.f32 1.0, %v3376_v47  ;;  %v3408_v37 = vld [vmem:[%s3913_s23 + $0x88] sm:$0xff] }
 0x302   : > { %v1965_v63 = vmul.f32 %v1927_v8, %v1844_v42  ;;  %3377 = vtanh.f32 %v2078_v59 }
 0x303   : > { %2520 = vst [vmem:[%s4519_s30 + $0x68] sm:$0xff] %v2482_v18  ;;  %v2191_v9 = vmul.f32 %v2153_v30, %v1887_v6 }
 0x304   : > { %v2325_v0 = vpop.f32.mrf.mxu0  ;;  %v2003_v4 = vmul.f32 %v1965_v63, %v1844_v42 }
 0x305   : > { %v2399_v43 = vadd.f32 %v3405_v62, %v2325_v0  ;;  %v1846_v21 = vpop.f32.mrf.mxu3  ;;  %v2213_v34 = vpack.c.bf16 %v2191_v9, %v2190_v23 }
 0x306   : > { %v1847_v17 = vadd.f32 %v4495_v44, %v1846_v21  ;;  %v2041_v3 = vadd.f32 %v2003_v4, %v1844_v42 }
 0x307   : > { %v2441_v25 = vmul.f32 %v4503_v11, %v2399_v43  ;;  %2364 = vmatmul.bf16.gmra.mxu0 %v2213_v34 }
 0x308   : > { %v1928_v7 = vmul.f32 0.044715, %v1847_v17  ;;  %v2079_v57 = vmul.f32 0.7978846, %v2041_v3  ;;  %v3378_v40 = vpop.eup %3377  ;;  %v1890_v23 = vmul.f32 0.5, %v1847_v17  ;;  %v3409_v3 = vld [vmem:[%s3913_s23 + $0x90] sm:$0xff] }
 0x309   : > { %v2483_v58 = vadd.f32 %v4509_v2, %v2441_v25  ;;  %v2154_v1 = vadd.f32 1.0, %v3378_v40 }
 0x30a   : > { %v1966_v56 = vmul.f32 %v1928_v7, %v1847_v17  ;;  %3379 = vtanh.f32 %v2079_v57 }
 0x30b   : > { %2521 = vst [vmem:[%s4519_s30 + $0x70] sm:$0xff] %v2483_v58  ;;  %v2192_v15 = vmul.f32 %v2154_v1, %v1888_v16 }
 0x30c   : > { %v2327_v31 = vpop.f32.mrf.mxu0  ;;  %v2004_v12 = vmul.f32 %v1966_v56, %v1847_v17 }
 0x30d   : > { %v2400_v54 = vadd.f32 %v3406_v45, %v2327_v31  ;;  %v1848_v22 = vpop.f32.mrf.mxu3 }
 0x30e   : > { %v1849_v20 = vadd.f32 %v4495_v44, %v1848_v22  ;;  %v2042_v5 = vadd.f32 %v2004_v12, %v1847_v17  ;;  %v3410_v12 = vld [vmem:[%s3913_s23 + $0x98] sm:$0xff] }
 0x30f   : > { %v2442_v51 = vmul.f32 %v4503_v11, %v2400_v54 }
 0x310   : > { %v3380_v29 = vpop.eup %3379  ;;  %v1929_v24 = vmul.f32 0.044715, %v1849_v20  ;;  %v2080_v27 = vmul.f32 0.7978846, %v2042_v5  ;;  %v1891_v9 = vmul.f32 0.5, %v1849_v20 }
 0x311   : > { %v2484_v52 = vadd.f32 %v4509_v2, %v2442_v51  ;;  %v2155_v35 = vadd.f32 1.0, %v3380_v29 }
 0x312   : > { %v1967_v46 = vmul.f32 %v1929_v24, %v1849_v20  ;;  %3381 = vtanh.f32 %v2080_v27 }
 0x313   : > { %2522 = vst [vmem:[%s4519_s30 + $0x78] sm:$0xff] %v2484_v52  ;;  %v2193_v32 = vmul.f32 %v2155_v35, %v1889_v28  ;;  %v3411_v28 = vld [vmem:[%s3913_s23 + $0xa0] sm:$0xff] }
 0x314   : > { %v2330_v13 = vpop.f32.mrf.mxu0  ;;  %v2005_v48 = vmul.f32 %v1967_v46, %v1849_v20 }
 0x315   : > { %v2401_v26 = vadd.f32 %v3407_v38, %v2330_v13  ;;  %v1851_v49 = vpop.f32.mrf.mxu3  ;;  %v2214_v41 = vpack.c.bf16 %v2193_v32, %v2192_v15  ;;  %v3412_v13 = vld [vmem:[%s3913_s23 + $0xa8] sm:$0xff] }
 0x316   : > { %v1852_v53 = vadd.f32 %v4495_v44, %v1851_v49  ;;  %v2043_v60 = vadd.f32 %v2005_v48, %v1849_v20 }
 0x317   : > { %v2443_v55 = vmul.f32 %v4503_v11, %v2401_v26  ;;  %2369 = vmatmul.bf16.gmra.mxu0 %v2214_v41  ;;  %v3413_v41 = vld [vmem:[%s3913_s23 + $0xb0] sm:$0xff] }
 0x318   : > { %v1930_v36 = vmul.f32 0.044715, %v1852_v53  ;;  %v2081_v10 = vmul.f32 0.7978846, %v2043_v60  ;;  %v3382_v19 = vpop.eup %3381  ;;  %v1892_v51 = vmul.f32 0.5, %v1852_v53 }
 0x319   : > { %v2485_v50 = vadd.f32 %v4509_v2, %v2443_v55  ;;  %v2156_v6 = vadd.f32 1.0, %v3382_v19 }
 0x31a   : > { %v1968_v61 = vmul.f32 %v1930_v36, %v1852_v53  ;;  %3383 = vtanh.f32 %v2081_v10  ;;  %v3414_v10 = vld [vmem:[%s3913_s23 + $0xb8] sm:$0xff] }
 0x31b   : > { %2523 = vst [vmem:[%s4519_s30 + $0x80] sm:$0xff] %v2485_v50  ;;  %v2194_v43 = vmul.f32 %v2156_v6, %v1890_v23 }
 0x31c   : > { %v2332_v42 = vpop.f32.mrf.mxu0  ;;  %v2006_v14 = vmul.f32 %v1968_v61, %v1852_v53 }
 0x31d   : > { %v2402_v39 = vadd.f32 %v3408_v37, %v2332_v42  ;;  %v1853_v47 = vpop.f32.mrf.mxu3 }
 0x31e   : > { %v1854_v8 = vadd.f32 %v4495_v44, %v1853_v47  ;;  %v2044_v18 = vadd.f32 %v2006_v14, %v1852_v53  ;;  %v3415_v14 = vld [vmem:[%s3913_s23 + $0xc0] sm:$0xff] }
 0x31f   : > { %v2444_v33 = vmul.f32 %v4503_v11, %v2402_v39 }
 0x320   : > { %v3384_v30 = vpop.eup %3383  ;;  %v1931_v63 = vmul.f32 0.044715, %v1854_v8  ;;  %v2082_v62 = vmul.f32 0.7978846, %v2044_v18  ;;  %v1893_v1 = vmul.f32 0.5, %v1854_v8  ;;  %v3416_v18 = vld [vmem:[%s3913_s23 + $0xc8] sm:$0xff] }
 0x321   : > { %v2486_v59 = vadd.f32 %v4509_v2, %v2444_v33  ;;  %v2157_v0 = vadd.f32 1.0, %v3384_v30 }
 0x322   : > { %v1969_v4 = vmul.f32 %v1931_v63, %v1854_v8  ;;  %3385 = vtanh.f32 %v2082_v62  ;;  %v3418_v62 = vld [vmem:[%s3913_s23 + $0xd8] sm:$0xff] }
 0x323   : > { %2524 = vst [vmem:[%s4519_s30 + $0x88] sm:$0xff] %v2486_v59  ;;  %v2195_v21 = vmul.f32 %v2157_v0, %v1891_v9  ;;  %v3417_v59 = vld [vmem:[%s3913_s23 + $0xd0] sm:$0xff] }
 0x324   : > { %v2335_v44 = vpop.f32.mrf.mxu0  ;;  %v2007_v34 = vmul.f32 %v1969_v4, %v1854_v8 }
 0x325   : > { %v2403_v25 = vadd.f32 %v3409_v3, %v2335_v44  ;;  %v2215_v7 = vpack.c.bf16 %v2195_v21, %v2194_v43  ;;  %v3419_v3 = vld [vmem:[%s3913_s23 + $0xe0] sm:$0xff] }
 0x326   : > { %v2045_v57 = vadd.f32 %v2007_v34, %v1854_v8 }
 0x327   : > { %v2445_v58 = vmul.f32 %v4503_v11, %v2403_v25  ;;  %2374 = vmatmul.bf16.gmra.mxu0 %v2215_v7 }
 0x328   : > { %v2083_v17 = vmul.f32 0.7978846, %v2045_v57  ;;  %v3386_v40 = vpop.eup %3385 }
 0x329   : > { %v2487_v56 = vadd.f32 %v4509_v2, %v2445_v58  ;;  %v2158_v22 = vadd.f32 1.0, %v3386_v40 }
 0x32a   : > { %3387 = vtanh.f32 %v2083_v17  ;;  %v3420_v17 = vld [vmem:[%s3913_s23 + $0xe8] sm:$0xff] }
 0x32b   : > { %2525 = vst [vmem:[%s4519_s30 + $0x90] sm:$0xff] %v2487_v56  ;;  %v2196_v24 = vmul.f32 %v2158_v22, %v1892_v51  ;;  %v3422_v51 = vld [vmem:[%s3913_s23 + $0xf8] sm:$0xff] }
 0x32c   : > { %v2337_v31 = vpop.f32.mrf.mxu0 }
 0x32d   : > { %v2404_v45 = vadd.f32 %v3410_v12, %v2337_v31 }
 0x32f   : > { %v2446_v54 = vmul.f32 %v4503_v11, %v2404_v45  ;;  %v3421_v45 = vld [vmem:[%s3913_s23 + $0xf0] sm:$0xff] }
 0x330   : > { %v3388_v20 = vpop.eup %3387 }
 0x331   : > { %v2488_v5 = vadd.f32 %v4509_v2, %v2446_v54  ;;  %v2159_v29 = vadd.f32 1.0, %v3388_v20 }
 0x333   : > { %2526 = vst [vmem:[%s4519_s30 + $0x98] sm:$0xff] %v2488_v5  ;;  %v2197_v52 = vmul.f32 %v2159_v29, %v1893_v1 }
 0x334   : > { %v2340_v16 = vpop.f32.mrf.mxu0 }
 0x335   : > { %v2405_v35 = vadd.f32 %v3411_v28, %v2340_v16  ;;  %v2216_v46 = vpack.c.bf16 %v2197_v52, %v2196_v24  ;;  %v3423_v16 = vld [vmem:[%s3913_s23 + $0x100] sm:$0xff] }
 0x337   : > { %v2447_v27 = vmul.f32 %v4503_v11, %v2405_v35  ;;  %2379 = vmatmul.bf16.gmra.mxu0 %v2216_v46 }
 0x339   : > { %v2489_v15 = vadd.f32 %v4509_v2, %v2447_v27 }
 0x33b   : > { %2527 = vst [vmem:[%s4519_s30 + $0xa0] sm:$0xff] %v2489_v15  ;;  %v3424_v15 = vld [vmem:[%s3913_s23 + $0x108] sm:$0xff] }
 0x33c   : > { %v2342_v32 = vpop.f32.mrf.mxu0 }
 0x33d   : > { %v2406_v48 = vadd.f32 %v3412_v13, %v2342_v32 }
 0x33f   : > { %v2448_v38 = vmul.f32 %v4503_v11, %v2406_v48 }
 0x341   : > { %v2490_v26 = vadd.f32 %v4509_v2, %v2448_v38 }
 0x343   : > { %2528 = vst [vmem:[%s4519_s30 + $0xa8] sm:$0xff] %v2490_v26  ;;  %v3425_v26 = vld [vmem:[%s3913_s23 + $0x110] sm:$0xff] }
 0x344   : > { %v2345_v49 = vpop.f32.mrf.mxu0 }
 0x345   : > { %v2407_v53 = vadd.f32 %v3413_v41, %v2345_v49 }
 0x347   : > { %v2449_v60 = vmul.f32 %v4503_v11, %v2407_v53 }
 0x349   : > { %v2491_v55 = vadd.f32 %v4509_v2, %v2449_v60 }
 0x34b   : > { %2529 = vst [vmem:[%s4519_s30 + $0xb0] sm:$0xff] %v2491_v55  ;;  %v3426_v55 = vld [vmem:[%s3913_s23 + $0x118] sm:$0xff] }
 0x34c   : > { %v2347_v36 = vpop.f32.mrf.mxu0 }
 0x34d   : > { %v2408_v50 = vadd.f32 %v3414_v10, %v2347_v36 }
 0x34f   : > { %v2450_v61 = vmul.f32 %v4503_v11, %v2408_v50 }
 0x351   : > { %v2492_v19 = vadd.f32 %v4509_v2, %v2450_v61 }
 0x353   : > { %2530 = vst [vmem:[%s4519_s30 + $0xb8] sm:$0xff] %v2492_v19  ;;  %v3427_v19 = vld [vmem:[%s3913_s23 + $0x120] sm:$0xff] }
 0x354   : > { %v2350_v42 = vpop.f32.mrf.mxu0 }
 0x355   : > { %v2409_v37 = vadd.f32 %v3415_v14, %v2350_v42 }
 0x357   : > { %v2451_v39 = vmul.f32 %v4503_v11, %v2409_v37 }
 0x359   : > { %v2493_v47 = vadd.f32 %v4509_v2, %v2451_v39 }
 0x35b   : > { %2531 = vst [vmem:[%s4519_s30 + $0xc0] sm:$0xff] %v2493_v47  ;;  %v3428_v47 = vld [vmem:[%s3913_s23 + $0x128] sm:$0xff] }
 0x35c   : > { %v2352_v8 = vpop.f32.mrf.mxu0 }
 0x35d   : > { %v2410_v33 = vadd.f32 %v3416_v18, %v2352_v8 }
 0x35f   : > { %v2452_v6 = vmul.f32 %v4503_v11, %v2410_v33 }
 0x361   : > { %v2494_v30 = vadd.f32 %v4509_v2, %v2452_v6 }
 0x363   : > { %2532 = vst [vmem:[%s4519_s30 + $0xc8] sm:$0xff] %v2494_v30 }
 0x364   : > { %v2355_v63 = vpop.f32.mrf.mxu0 }
 0x365   : > { %v2411_v23 = vadd.f32 %v3417_v59, %v2355_v63 }
 0x367   : > { %v2453_v9 = vmul.f32 %v4503_v11, %v2411_v23 }
 0x369   : > { %v2495_v0 = vadd.f32 %v4509_v2, %v2453_v9 }
 0x36b   : > { %2533 = vst [vmem:[%s4519_s30 + $0xd0] sm:$0xff] %v2495_v0 }
 0x36c   : > { %v2357_v4 = vpop.f32.mrf.mxu0 }
 0x36d   : > { %v2412_v43 = vadd.f32 %v3418_v62, %v2357_v4 }
 0x36f   : > { %v2454_v21 = vmul.f32 %v4503_v11, %v2412_v43 }
 0x371   : > { %v2496_v44 = vadd.f32 %v4509_v2, %v2454_v21 }
 0x373   : > { %2534 = vst [vmem:[%s4519_s30 + $0xd8] sm:$0xff] %v2496_v44 }
 0x374   : > { %v2360_v34 = vpop.f32.mrf.mxu0 }
 0x375   : > { %v2413_v25 = vadd.f32 %v3419_v3, %v2360_v34 }
 0x377   : > { %v2455_v7 = vmul.f32 %v4503_v11, %v2413_v25 }
 0x379   : > { %v2497_v57 = vadd.f32 %v4509_v2, %v2455_v7 }
 0x37b   : > { %2535 = vst [vmem:[%s4519_s30 + $0xe0] sm:$0xff] %v2497_v57 }
 0x37c   : > { %v2362_v58 = vpop.f32.mrf.mxu0 }
 0x37d   : > { %v2414_v56 = vadd.f32 %v3420_v17, %v2362_v58 }
 0x37f   : > { %v2456_v40 = vmul.f32 %v4503_v11, %v2414_v56 }
 0x381   : > { %v2498_v31 = vadd.f32 %v4509_v2, %v2456_v40 }
 0x383   : > { %2536 = vst [vmem:[%s4519_s30 + $0xe8] sm:$0xff] %v2498_v31 }
 0x384   : > { %v2365_v12 = vpop.f32.mrf.mxu0 }
 0x385   : > { %v2415_v54 = vadd.f32 %v3421_v45, %v2365_v12 }
 0x387   : > { %v2457_v22 = vmul.f32 %v4503_v11, %v2415_v54 }
 0x389   : > { %v2499_v20 = vadd.f32 %v4509_v2, %v2457_v22 }
 0x38b   : > { %2537 = vst [vmem:[%s4519_s30 + $0xf0] sm:$0xff] %v2499_v20 }
 0x38c   : > { %v2367_v5 = vpop.f32.mrf.mxu0 }
 0x38d   : > { %v2416_v1 = vadd.f32 %v3422_v51, %v2367_v5 }
 0x38f   : > { %v2458_v29 = vmul.f32 %v4503_v11, %v2416_v1 }
 0x391   : > { %v2500_v24 = vadd.f32 %v4509_v2, %v2458_v29 }
 0x393   : > { %2538 = vst [vmem:[%s4519_s30 + $0xf8] sm:$0xff] %v2500_v24 }
 0x394   : > { %v2370_v52 = vpop.f32.mrf.mxu0 }
 0x395   : > { %v2417_v28 = vadd.f32 %v3423_v16, %v2370_v52 }
 0x397   : > { %v2459_v35 = vmul.f32 %v4503_v11, %v2417_v28 }
 0x399   : > { %v2501_v46 = vadd.f32 %v4509_v2, %v2459_v35 }
 0x39b   : > { %2539 = vst [vmem:[%s4519_s30 + $0x100] sm:$0xff] %v2501_v46 }
 0x39c   : > { %v2372_v27 = vpop.f32.mrf.mxu0 }
 0x39d   : > { %v2418_v32 = vadd.f32 %v3424_v15, %v2372_v27 }
 0x39f   : > { %v2460_v13 = vmul.f32 %v4503_v11, %v2418_v32 }
 0x3a1   : > { %v2502_v48 = vadd.f32 %v4509_v2, %v2460_v13 }
 0x3a3   : > { %2540 = vst [vmem:[%s4519_s30 + $0x108] sm:$0xff] %v2502_v48 }
 0x3a4   : > { %v2375_v38 = vpop.f32.mrf.mxu0 }
 0x3a5   : > { %v2419_v49 = vadd.f32 %v3425_v26, %v2375_v38 }
 0x3a7   : > { %v2461_v41 = vmul.f32 %v4503_v11, %v2419_v49 }
 0x3a9   : > { %v2503_v53 = vadd.f32 %v4509_v2, %v2461_v41 }
 0x3ab   : > { %2541 = vst [vmem:[%s4519_s30 + $0x110] sm:$0xff] %v2503_v53 }
 0x3ac   : > { %v2377_v60 = vpop.f32.mrf.mxu0 }
 0x3ad   : > { %v2420_v36 = vadd.f32 %v3426_v55, %v2377_v60 }
 0x3af   : > { %v2462_v10 = vmul.f32 %v4503_v11, %v2420_v36 }
 0x3b1   : > { %v2504_v50 = vadd.f32 %v4509_v2, %v2462_v10 }
 0x3b3   : > { %2542 = vst [vmem:[%s4519_s30 + $0x118] sm:$0xff] %v2504_v50 }
 0x3b4   : > { %v2380_v61 = vpop.f32.mrf.mxu0 }
 0x3b5   : > { %v2421_v42 = vadd.f32 %v3427_v19, %v2380_v61 }
 0x3b7   : > { %v2463_v14 = vmul.f32 %v4503_v11, %v2421_v42 }
 0x3b9   : > { %v2505_v37 = vadd.f32 %v4509_v2, %v2463_v14 }
 0x3bb   : > { %2543 = vst [vmem:[%s4519_s30 + $0x120] sm:$0xff] %v2505_v37 }
 0x3bc   : > { %v2382_v39 = vpop.f32.mrf.mxu0 }
 0x3bd   : > { %v2422_v8 = vadd.f32 %v3428_v47, %v2382_v39 }
 0x3bf   : > { %v2464_v18 = vmul.f32 %v4503_v11, %v2422_v8 }
 0x3c1   : > { %v2506_v33 = vadd.f32 %v4509_v2, %v2464_v18 }
 0x3c3   : > { %2544 = vst [vmem:[%s4519_s30 + $0x128] sm:$0xff] %v2506_v33 }
 0x3c4   : > { %3636 = shalt.err (!%p3633_p2)
}
 0x3c5   : > { %s3701_s3 = smov 128   ;;  %s3702_s22 = smov 8  }
 0x3c6   : > { %3155 = dma.vmem_to_hbm [thread:$0]  (%p3842_p3), %s2559_s24, 4864, %s2561_s19, %s2546_s17, %s3701_s3, %s3701_s3, %s3702_s22  }
 0x3c7 PF: > { %s4762_s5 = sld [smem:[#allocation20_spill]]  ;;  %p4764_p12 = scmp.ge.s32.totalorder %s3691_s16, 2 }
 0x3c9   : > { %p3178_p13 = pnand %p4764_p12, %p3793_p6 }
 0x3cb   : > { %p3179_p0 = pneg %p3178_p13 }
 0x3cd   : > { %s2575_s28 = sand.u32 1, %s4762_s5  }
 0x3ce   : > { %s2576_s20 = scalar_lea.sflag [#allocation4], %s2575_s28 }
 0x3cf   : > { %3674 = dma.done.wait (%p3179_p0), %s2576_s20, 4864  }
 0x3d0   : > { %3676 = vsyncadd (%p3179_p0), %s2576_s20, 4294962432  ;;  %s4765_s16 = sld [smem:[#allocation23_spill]]  ;;  %s4768_s13 = smov %s3683_s14 }
 0x3d1   : > { %s4766_s30 = sld [smem:[#allocation21_spill]] }
 0x3d2   : > { %s4767_s15 = sld [smem:[#allocation24_spill]] }
 0x3d6   : > { %p28_p5 = scmp.ge.s32.totalorder %s4765_s16, 4  }
 0x3d7   : > { %s4769_s14 = smov %s4766_s30 }
 0x3d8   :  { %30 = sbr.rel (!%p28_p5) target bundleno = 14 (0xe), region = 134 }
 0x3dd   :  { %2582 = vsyncpa [#allocation3], 1 }
 0x3de   :  { %2584 = vsyncpa [#allocation3 + $0x1], 1 }
 0x3df   :  { %2585 = vsyncpa [#allocation6], 1 }
 0x3e0   :  { %2587 = vsyncpa [#allocation6 + $0x1], 1 }
 0x3e1   :  { %2588 = vsyncpa [#allocation9], 1 }
 0x3e2   :  { %2589 = vsyncpa [#allocation12], 1 }
 0x3e3   :  { %2590 = vsyncpa [#allocation4], 1 }
 0x3e4   :  { %2592 = vsyncpa [#allocation4 + $0x1], 1 }

</bundles_post_ra>
